<compile_context>
chip_gen: v7x
topology: tpu7x:2x2x1
jax: 0.10.0
libtpu: 0.0.40
codegen_flags: <defaults>
</compile_context>

<pallas_src>
import math
import functools

import jax
import jax.numpy as jnp
from jax import lax
from jax.experimental import pallas as pl
from jax.experimental.pallas import tpu as pltpu


# --------------------------- Fused forward kernel ---------------------------
def _mha_fused_kernel(mb_ref,                          # SMEM (3,): [w_t, w_d, b] of mat_bias
                      xq_ref, xk_ref, xv_ref,          # (bb, seq, d_model) activations
                      wqkv_ref,                        # (d_model, 3*d_model)  [Wq|Wk|Wv]
                      bqkv_ref,                        # (1, 3*d_model)
                      wo_ref,                          # (d_model, d_model) (in, out) layout
                      bo_ref,                          # (1, d_model)
                      t_ref, d_ref,                    # (bb, seq, seq) f32
                      m_ref,                           # (bb, seq, seq) int8 mask
                      o_ref,                           # (bb, seq, d_model)
                      *, heads, d_k, mat_scale):
    f32 = jnp.float32
    bb, seq, dm = xq_ref.shape

    wqkv = wqkv_ref[...]
    bqkv = bqkv_ref[...]

    # ---- input projections on the flattened (bb*seq, d_model) slab -----------
    xq = xq_ref[...].reshape(bb * seq, dm)
    xk = xk_ref[...].reshape(bb * seq, dm)
    xv = xv_ref[...].reshape(bb * seq, dm)

    qp = jnp.dot(xq, wqkv[:, 0:dm],       preferred_element_type=f32) + bqkv[:, 0:dm]
    kp = jnp.dot(xk, wqkv[:, dm:2 * dm],  preferred_element_type=f32) + bqkv[:, dm:2 * dm]
    vp = jnp.dot(xv, wqkv[:, 2 * dm:],    preferred_element_type=f32) + bqkv[:, 2 * dm:]
    qp = qp.reshape(bb, seq, dm)
    kp = kp.reshape(bb, seq, dm)
    vp = vp.reshape(bb, seq, dm)

    # ---- batch-only terms, hoisted out of the head loop ----------------------
    e = jnp.float32(math.e)
    bt = 1.0 / jnp.log(e + t_ref[...] * mat_scale)          # (bb, seq, seq)
    bd = 1.0 / jnp.log(e + d_ref[...] * mat_scale)
    bias = mb_ref[0] * bt + mb_ref[1] * bd + mb_ref[2]        # nn.Linear(2,1) on [bt, bd]
    mask_f = m_ref[...].astype(f32)                           # int8 over HBM, f32 in vregs

    scale = jnp.float32(1.0 / math.sqrt(d_k))
    dn = (((1,), (1,)), ((), ()))        # contract last dims of q and k (no transpose)

    concat_rows = []
    for b in range(bb):                  # static, small (batch block)
        mask0 = mask_f[b] == 0.0         # masked_fill(mask == 0, -1e9)
        bias_b = bias[b]
        head_outs = []
        for h in range(heads):           # static, unrolled; lane slices of width d_k
            sl = slice(h * d_k, (h + 1) * d_k)
            qh, kh, vh = qp[b, :, sl], kp[b, :, sl], vp[b, :, sl]
            s = lax.dot_general(qh, kh, dn, preferred_element_type=f32) * scale
            s = jnp.where(mask0, jnp.float32(-1e9), s + bias_b)
            # numerically stable softmax; row-sum reciprocal + multiply keeps the
            # EUP divide count at ~seq per head instead of seq^2.
            m = jnp.max(s, axis=-1, keepdims=True)
            p = jnp.exp(s - m)
            p = p * pl.reciprocal(jnp.sum(p, axis=-1, keepdims=True), approx=False)
            # TODO(synk): dropout on attention probs omitted (eval/inference -> identity).
            head_outs.append(jnp.dot(p, vh, preferred_element_type=f32))  # (seq, d_k)
        concat_rows.append(jnp.concatenate(head_outs, axis=-1))           # (seq, d_model)

    concat = jnp.concatenate(concat_rows, axis=0)                          # (bb*seq, d_model)
    # single output projection: K = d_model (full MXU fill)
    out = jnp.dot(concat, wo_ref[...], preferred_element_type=f32) + bo_ref[...]
    o_ref[...] = out.reshape(bb, seq, dm).astype(o_ref.dtype)


# ------------------------------ Wrapper / prep -------------------------------
def prepare_params(params):
    """One-time prep: pre-transpose weights to (d_in, d_out), pack Wq|Wk|Wv (and
    their biases) into single arrays, and pack the 3 mat_bias scalars for SMEM."""
    f32 = jnp.float32
    wq_t = jnp.asarray(params["wq"], f32).T
    wk_t = jnp.asarray(params["wk"], f32).T
    wv_t = jnp.asarray(params["wv"], f32).T
    prep = {
        "wqkv": jnp.concatenate([wq_t, wk_t, wv_t], axis=1),        # (d_model, 3*d_model)
        "bqkv": jnp.concatenate(
            [jnp.asarray(params["bq"], f32),
             jnp.asarray(params["bk"], f32),
             jnp.asarray(params["bv"], f32)]).reshape(1, -1),       # (1, 3*d_model)
        "wo_t": jnp.asarray(params["wo"], f32).T,                   # (d_model, d_model)
        "bo":   jnp.asarray(params["bo"], f32).reshape(1, -1),      # (1, d_model)
        "mb":   jnp.concatenate(
            [jnp.asarray(params["mat_w"], f32).reshape(-1),
             jnp.asarray(params["mat_b"], f32).reshape(-1)]),       # (3,)
    }
    return prep


def _const_spec(shape):
    """Loop-invariant operand: request single buffering (VMEM headroom on v7x);
    fall back gracefully if this jax version lacks pipeline_mode."""
    idx = lambda i: (0,) * len(shape)
    try:
        return pl.BlockSpec(shape, idx, pipeline_mode=pl.Buffered(1))
    except Exception:  # pragma: no cover - older jax without pipeline_mode
        return pl.BlockSpec(shape, idx)


@functools.partial(jax.jit, static_argnames=("heads", "city"))
def multi_head_attention(q, k, v, temporal_mat, dis_mat, mask, prep, *, heads, city):
    bs, seq, d_model = q.shape
    d_k = d_model // heads
    mat_scale = 100.0 if city == "Porto" else 1.0

    # ---- batch blocking: largest divisor of bs whose per-block bytes fit budget
    per_batch_bytes = (3 * seq * d_model + 2 * seq * seq) * 4 + seq * seq
    budget = 4 * 1024 * 1024
    batch_block = 1
    for cand in range(bs, 0, -1):
        if bs % cand == 0 and cand * per_batch_bytes <= budget:
            batch_block = cand
            break
    bb = batch_block
    grid = (bs // bb,)

    # ---- mask as int8 (robust to non-exact 0/1 floats, 4x less DMA) ----------
    mask_i8 = (mask != 0).astype(jnp.int8)

    kernel = functools.partial(_mha_fused_kernel, heads=heads, d_k=d_k,
                               mat_scale=mat_scale)

    act_spec = pl.BlockSpec((bb, seq, d_model), lambda i: (i, 0, 0))
    mat_spec = pl.BlockSpec((bb, seq, seq), lambda i: (i, 0, 0))
    wqkv_spec = _const_spec((d_model, 3 * d_model))
    bqkv_spec = _const_spec((1, 3 * d_model))
    wo_spec = _const_spec((d_model, d_model))
    bo_spec = _const_spec((1, d_model))

    # ---- scoped-VMEM limit derived from the actual block sizes ---------------
    in_block_bytes = (3 * bb * seq * d_model * 4        # activations
                      + 2 * bb * seq * seq * 4          # temporal / distance
                      + bb * seq * seq * 1)             # int8 mask
    out_block_bytes = bb * seq * d_model * 4
    const_bytes = (3 * d_model * d_model + d_model * d_model + 4 * d_model) * 4
    vmem_needed = 2 * (in_block_bytes + out_block_bytes) + const_bytes
    vmem_limit = int(min(100 * 1024 * 1024, max(32 * 1024 * 1024, 2 * vmem_needed)))

    return pl.pallas_call(
        kernel,
        out_shape=jax.ShapeDtypeStruct((bs, seq, d_model), jnp.float32),
        grid=grid,
        in_specs=[pl.BlockSpec(memory_space=pltpu.MemorySpace.SMEM),  # mat_bias params
                  act_spec, act_spec, act_spec,
                  wqkv_spec, bqkv_spec, wo_spec, bo_spec,
                  mat_spec, mat_spec, mat_spec],
        out_specs=act_spec,
        compiler_params=pltpu.CompilerParams(
            dimension_semantics=("parallel",),
            vmem_limit_bytes=vmem_limit),
    )(prep["mb"], q, k, v,
      prep["wqkv"], prep["bqkv"], prep["wo_t"], prep["bo"],
      temporal_mat, dis_mat, mask_i8)


# ----------------------------- Pure-JAX reference ---------------------------
def reference(q, k, v, temporal_mat, dis_mat, mask, params, *, heads, city):
    bs, seq, d_model = q.shape
    d_k = d_model // heads

    def lin(x, w, b):
        return x @ w.T + b

    def split(x):
        return x.reshape(bs, seq, heads, d_k).transpose(0, 2, 1, 3)

    Q, K, V = (split(lin(q, params["wq"], params["bq"])),
               split(lin(k, params["wk"], params["bk"])),
               split(lin(v, params["wv"], params["bv"])))
    s = jnp.einsum("bhqd,bhkd->bhqk", Q, K) / math.sqrt(d_k)
    c = 100.0 if city == "Porto" else 1.0
    bt = 1.0 / jnp.log(math.e + temporal_mat * c)
    bd = 1.0 / jnp.log(math.e + dis_mat * c)
    all_mat = jnp.stack([bt, bd], axis=-1) @ params["mat_w"].T + params["mat_b"]
    s = s + all_mat.squeeze(-1)[:, None, :, :]
    s = jnp.where(mask[:, None, :, :] == 0, -1e9, s)
    p = jax.nn.softmax(s, axis=-1)
    o = jnp.einsum("bhqk,bhkd->bhqd", p, V)
    concat = o.transpose(0, 2, 1, 3).reshape(bs, seq, d_model)
    return lin(concat, params["wo"], params["bo"])


# --------------------------------- main --------------------------------------
if __name__ == "__main__":
    bs, seq, d_model, heads = 2, 8, 32, 4
    city = "yancheng"

    key = jax.random.PRNGKey(0)
    keys = jax.random.split(key, 16)

    def init_linear(k1, k2, d_out, d_in):
        bound = 1.0 / math.sqrt(d_in)
        w = jax.random.uniform(k1, (d_out, d_in), jnp.float32, -bound, bound)
        b = jax.random.uniform(k2, (d_out,), jnp.float32, -bound, bound)
        return w, b

    wq, bq = init_linear(keys[0], keys[1], d_model, d_model)
    wk, bk = init_linear(keys[2], keys[3], d_model, d_model)
    wv, bv = init_linear(keys[4], keys[5], d_model, d_model)
    wo, bo = init_linear(keys[6], keys[7], d_model, d_model)
    mat_w, mat_b = init_linear(keys[8], keys[9], 1, 2)  # nn.Linear(2, 1)
    params = dict(wq=wq, bq=bq, wk=wk, bk=bk, wv=wv, bv=bv, wo=wo, bo=bo,
                  mat_w=mat_w, mat_b=mat_b)

    q = jax.random.normal(keys[10], (bs, seq, d_model), jnp.float32)
    k = jax.random.normal(keys[11], (bs, seq, d_model), jnp.float32)
    v = jax.random.normal(keys[12], (bs, seq, d_model), jnp.float32)
    temporal_mat = jax.random.uniform(keys[13], (bs, seq, seq), jnp.float32,
                                      0.0, 10.0)
    dis_mat = jax.random.uniform(keys[14], (bs, seq, seq), jnp.float32,
                                 0.0, 10.0)
    # causal 0/1 mask, broadcast over batch
    mask = jnp.broadcast_to(
        jnp.tril(jnp.ones((seq, seq), jnp.float32)), (bs, seq, seq))

    prep = prepare_params(params)   # packed QKV weights, pre-transposed, SMEM scalars
    out = multi_head_attention(q, k, v, temporal_mat, dis_mat, mask, prep,
                               heads=heads, city=city)
    out = jax.block_until_ready(out)

    ref = reference(q, k, v, temporal_mat, dis_mat, mask, params,
                    heads=heads, city=city)
    assert out.shape == (bs, seq, d_model)
    assert jnp.allclose(out, ref, rtol=1e-4, atol=1e-4), (
        float(jnp.max(jnp.abs(out - ref))))
    print("KERNEL_OK")
</pallas_src>

<mosaic_0001>
module attributes {stable_mosaic.version = 11 : i64} {
  func.func @_mha_fused_kernel(%arg0: i32, %arg1: memref<3xf32, #tpu.memory_space<smem>>, %arg2: memref<2x8x32xf32, #tpu.memory_space<vmem>>, %arg3: memref<2x8x32xf32, #tpu.memory_space<vmem>>, %arg4: memref<2x8x32xf32, #tpu.memory_space<vmem>>, %arg5: memref<32x96xf32, #tpu.memory_space<vmem>>, %arg6: memref<1x96xf32, #tpu.memory_space<vmem>>, %arg7: memref<32x32xf32, #tpu.memory_space<vmem>>, %arg8: memref<1x32xf32, #tpu.memory_space<vmem>>, %arg9: memref<2x8x8xf32, #tpu.memory_space<vmem>>, %arg10: memref<2x8x8xf32, #tpu.memory_space<vmem>>, %arg11: memref<2x8x8xi8, #tpu.memory_space<vmem>>, %arg12: memref<2x8x32xf32, #tpu.memory_space<vmem>>) attributes {dimension_semantics = [#tpu.dimension_semantics<parallel>], iteration_bounds = array<i64: 1>, scalar_prefetch = 0 : i64, scratch_operands = 0 : i64, tpu.core_type = #tpu.core_type<tc>, window_params = [{transform_indices = @transform_0, window_bounds = array<i64: 3>}, {transform_indices = @transform_1, window_bounds = array<i64: 2, 8, 32>}, {transform_indices = @transform_2, window_bounds = array<i64: 2, 8, 32>}, {transform_indices = @transform_3, window_bounds = array<i64: 2, 8, 32>}, {pipeline_mode = #tpu.pipeline_mode<synchronous>, transform_indices = @transform_4, window_bounds = array<i64: 32, 96>}, {pipeline_mode = #tpu.pipeline_mode<synchronous>, transform_indices = @transform_5, window_bounds = array<i64: 1, 96>}, {pipeline_mode = #tpu.pipeline_mode<synchronous>, transform_indices = @transform_6, window_bounds = array<i64: 32, 32>}, {pipeline_mode = #tpu.pipeline_mode<synchronous>, transform_indices = @transform_7, window_bounds = array<i64: 1, 32>}, {transform_indices = @transform_8, window_bounds = array<i64: 2, 8, 8>}, {transform_indices = @transform_9, window_bounds = array<i64: 2, 8, 8>}, {transform_indices = @transform_10, window_bounds = array<i64: 2, 8, 8>}, {transform_indices = @transform_11, window_bounds = array<i64: 2, 8, 32>}]} {
    %c0 = arith.constant 0 : index
    %c0_0 = arith.constant 0 : index
    %0 = vector.load %arg5[%c0, %c0_0] : memref<32x96xf32, #tpu.memory_space<vmem>>, vector<32x96xf32>
    %c0_1 = arith.constant 0 : index
    %c0_2 = arith.constant 0 : index
    %1 = vector.load %arg6[%c0_1, %c0_2] : memref<1x96xf32, #tpu.memory_space<vmem>>, vector<1x96xf32>
    %c0_3 = arith.constant 0 : index
    %c0_4 = arith.constant 0 : index
    %c0_5 = arith.constant 0 : index
    %2 = vector.load %arg2[%c0_3, %c0_4, %c0_5] : memref<2x8x32xf32, #tpu.memory_space<vmem>>, vector<2x8x32xf32>
    %3 = vector.shape_cast %2 : vector<2x8x32xf32> to vector<16x32xf32>
    %c0_6 = arith.constant 0 : index
    %c0_7 = arith.constant 0 : index
    %c0_8 = arith.constant 0 : index
    %4 = vector.load %arg3[%c0_6, %c0_7, %c0_8] : memref<2x8x32xf32, #tpu.memory_space<vmem>>, vector<2x8x32xf32>
    %5 = vector.shape_cast %4 : vector<2x8x32xf32> to vector<16x32xf32>
    %c0_9 = arith.constant 0 : index
    %c0_10 = arith.constant 0 : index
    %c0_11 = arith.constant 0 : index
    %6 = vector.load %arg4[%c0_9, %c0_10, %c0_11] : memref<2x8x32xf32, #tpu.memory_space<vmem>>, vector<2x8x32xf32>
    %7 = vector.shape_cast %6 : vector<2x8x32xf32> to vector<16x32xf32>
    %8 = vector.extract_strided_slice %0 {offsets = [0, 0], sizes = [32, 32], strides = [1, 1]} : vector<32x96xf32> to vector<32x32xf32>
    %cst = arith.constant dense<0.000000e+00> : vector<16x32xf32>
    %9 = tpu.matmul %3, %8, %cst {dimension_numbers = #tpu.dot_dimension_numbers<[1], [0], [0], [1], [0, 0, 1, 1], [], []>} : vector<16x32xf32>, vector<32x32xf32>, vector<16x32xf32> -> vector<16x32xf32>
    %10 = vector.extract_strided_slice %1 {offsets = [0, 0], sizes = [1, 32], strides = [1, 1]} : vector<1x96xf32> to vector<1x32xf32>
    %11 = vector.broadcast %10 : vector<1x32xf32> to vector<16x32xf32>
    %12 = arith.addf %9, %11 : vector<16x32xf32>
    %13 = vector.extract_strided_slice %0 {offsets = [0, 32], sizes = [32, 32], strides = [1, 1]} : vector<32x96xf32> to vector<32x32xf32>
    %cst_12 = arith.constant dense<0.000000e+00> : vector<16x32xf32>
    %14 = tpu.matmul %5, %13, %cst_12 {dimension_numbers = #tpu.dot_dimension_numbers<[1], [0], [0], [1], [0, 0, 1, 1], [], []>} : vector<16x32xf32>, vector<32x32xf32>, vector<16x32xf32> -> vector<16x32xf32>
    %15 = vector.extract_strided_slice %1 {offsets = [0, 32], sizes = [1, 32], strides = [1, 1]} : vector<1x96xf32> to vector<1x32xf32>
    %16 = vector.broadcast %15 : vector<1x32xf32> to vector<16x32xf32>
    %17 = arith.addf %14, %16 : vector<16x32xf32>
    %18 = vector.extract_strided_slice %0 {offsets = [0, 64], sizes = [32, 32], strides = [1, 1]} : vector<32x96xf32> to vector<32x32xf32>
    %cst_13 = arith.constant dense<0.000000e+00> : vector<16x32xf32>
    %19 = tpu.matmul %7, %18, %cst_13 {dimension_numbers = #tpu.dot_dimension_numbers<[1], [0], [0], [1], [0, 0, 1, 1], [], []>} : vector<16x32xf32>, vector<32x32xf32>, vector<16x32xf32> -> vector<16x32xf32>
    %20 = vector.extract_strided_slice %1 {offsets = [0, 64], sizes = [1, 32], strides = [1, 1]} : vector<1x96xf32> to vector<1x32xf32>
    %21 = vector.broadcast %20 : vector<1x32xf32> to vector<16x32xf32>
    %22 = arith.addf %19, %21 : vector<16x32xf32>
    %23 = vector.shape_cast %12 : vector<16x32xf32> to vector<2x8x32xf32>
    %24 = vector.shape_cast %17 : vector<16x32xf32> to vector<2x8x32xf32>
    %25 = vector.shape_cast %22 : vector<16x32xf32> to vector<2x8x32xf32>
    %c0_14 = arith.constant 0 : index
    %c0_15 = arith.constant 0 : index
    %c0_16 = arith.constant 0 : index
    %26 = vector.load %arg9[%c0_14, %c0_15, %c0_16] : memref<2x8x8xf32, #tpu.memory_space<vmem>>, vector<2x8x8xf32>
    %cst_17 = arith.constant 1.000000e+00 : f32
    %27 = vector.broadcast %cst_17 : f32 to vector<2x8x8xf32>
    %28 = arith.mulf %26, %27 : vector<2x8x8xf32>
    %cst_18 = arith.constant 2.71828175 : f32
    %29 = vector.broadcast %cst_18 : f32 to vector<2x8x8xf32>
    %30 = arith.addf %29, %28 : vector<2x8x8xf32>
    %31 = math.log %30 : vector<2x8x8xf32>
    %cst_19 = arith.constant 1.000000e+00 : f32
    %32 = vector.broadcast %cst_19 : f32 to vector<2x8x8xf32>
    %33 = arith.divf %32, %31 : vector<2x8x8xf32>
    %c0_20 = arith.constant 0 : index
    %c0_21 = arith.constant 0 : index
    %c0_22 = arith.constant 0 : index
    %34 = vector.load %arg10[%c0_20, %c0_21, %c0_22] : memref<2x8x8xf32, #tpu.memory_space<vmem>>, vector<2x8x8xf32>
    %cst_23 = arith.constant 1.000000e+00 : f32
    %35 = vector.broadcast %cst_23 : f32 to vector<2x8x8xf32>
    %36 = arith.mulf %34, %35 : vector<2x8x8xf32>
    %cst_24 = arith.constant 2.71828175 : f32
    %37 = vector.broadcast %cst_24 : f32 to vector<2x8x8xf32>
    %38 = arith.addf %37, %36 : vector<2x8x8xf32>
    %39 = math.log %38 : vector<2x8x8xf32>
    %cst_25 = arith.constant 1.000000e+00 : f32
    %40 = vector.broadcast %cst_25 : f32 to vector<2x8x8xf32>
    %41 = arith.divf %40, %39 : vector<2x8x8xf32>
    %c0_26 = arith.constant 0 : index
    %42 = memref.load %arg1[%c0_26] : memref<3xf32, #tpu.memory_space<smem>>
    %43 = vector.broadcast %42 : f32 to vector<2x8x8xf32>
    %44 = arith.mulf %43, %33 : vector<2x8x8xf32>
    %c1 = arith.constant 1 : index
    %45 = memref.load %arg1[%c1] : memref<3xf32, #tpu.memory_space<smem>>
    %46 = vector.broadcast %45 : f32 to vector<2x8x8xf32>
    %47 = arith.mulf %46, %41 : vector<2x8x8xf32>
    %48 = arith.addf %44, %47 : vector<2x8x8xf32>
    %c2 = arith.constant 2 : index
    %49 = memref.load %arg1[%c2] : memref<3xf32, #tpu.memory_space<smem>>
    %50 = vector.broadcast %49 : f32 to vector<2x8x8xf32>
    %51 = arith.addf %48, %50 : vector<2x8x8xf32>
    %c0_27 = arith.constant 0 : index
    %c0_28 = arith.constant 0 : index
    %c0_29 = arith.constant 0 : index
    %52 = vector.load %arg11[%c0_27, %c0_28, %c0_29] : memref<2x8x8xi8, #tpu.memory_space<vmem>>, vector<2x8x8xi8>
    %53 = arith.sitofp %52 : vector<2x8x8xi8> to vector<2x8x8xf32>
    %54 = vector.extract_strided_slice %53 {offsets = [0, 0, 0], sizes = [1, 8, 8], strides = [1, 1, 1]} : vector<2x8x8xf32> to vector<1x8x8xf32>
    %55 = vector.shape_cast %54 : vector<1x8x8xf32> to vector<8x8xf32>
    %cst_30 = arith.constant 0.000000e+00 : f32
    %56 = vector.broadcast %cst_30 : f32 to vector<8x8xf32>
    %57 = arith.cmpf oeq, %55, %56 : vector<8x8xf32>
    %58 = vector.extract_strided_slice %51 {offsets = [0, 0, 0], sizes = [1, 8, 8], strides = [1, 1, 1]} : vector<2x8x8xf32> to vector<1x8x8xf32>
    %59 = vector.shape_cast %58 : vector<1x8x8xf32> to vector<8x8xf32>
    %60 = vector.extract_strided_slice %23 {offsets = [0, 0, 0], sizes = [1, 8, 8], strides = [1, 1, 1]} : vector<2x8x32xf32> to vector<1x8x8xf32>
    %61 = vector.shape_cast %60 : vector<1x8x8xf32> to vector<8x8xf32>
    %62 = vector.extract_strided_slice %24 {offsets = [0, 0, 0], sizes = [1, 8, 8], strides = [1, 1, 1]} : vector<2x8x32xf32> to vector<1x8x8xf32>
    %63 = vector.shape_cast %62 : vector<1x8x8xf32> to vector<8x8xf32>
    %64 = vector.extract_strided_slice %25 {offsets = [0, 0, 0], sizes = [1, 8, 8], strides = [1, 1, 1]} : vector<2x8x32xf32> to vector<1x8x8xf32>
    %65 = vector.shape_cast %64 : vector<1x8x8xf32> to vector<8x8xf32>
    %cst_31 = arith.constant dense<0.000000e+00> : vector<8x8xf32>
    %66 = tpu.matmul %61, %63, %cst_31 {dimension_numbers = #tpu.dot_dimension_numbers<[1], [1], [0], [0], [0, 0, 1, 0], [], []>} : vector<8x8xf32>, vector<8x8xf32>, vector<8x8xf32> -> vector<8x8xf32>
    %cst_32 = arith.constant 0.353553385 : f32
    %67 = vector.broadcast %cst_32 : f32 to vector<8x8xf32>
    %68 = arith.mulf %66, %67 : vector<8x8xf32>
    %69 = arith.addf %68, %59 : vector<8x8xf32>
    %cst_33 = arith.constant -1.000000e+09 : f32
    %70 = vector.broadcast %cst_33 : f32 to vector<8x8xf32>
    %71 = arith.select %57, %70, %69 : vector<8x8xi1>, vector<8x8xf32>
    %cst_34 = arith.constant dense<0xFF800000> : vector<8xf32>
    %72 = vector.multi_reduction <maximumf>, %71, %cst_34 [1] : vector<8x8xf32> to vector<8xf32>
    %73 = vector.shape_cast %72 : vector<8xf32> to vector<8x1xf32>
    %74 = vector.broadcast %73 : vector<8x1xf32> to vector<8x8xf32>
    %75 = arith.subf %71, %74 : vector<8x8xf32>
    %76 = math.exp %75 : vector<8x8xf32>
    %cst_35 = arith.constant dense<0.000000e+00> : vector<8xf32>
    %77 = vector.multi_reduction <add>, %76, %cst_35 [1] : vector<8x8xf32> to vector<8xf32>
    %78 = vector.shape_cast %77 : vector<8xf32> to vector<8x1xf32>
    %79 = tpu.reciprocal %78 : vector<8x1xf32> -> vector<8x1xf32>
    %80 = vector.broadcast %79 : vector<8x1xf32> to vector<8x8xf32>
    %81 = arith.mulf %76, %80 : vector<8x8xf32>
    %cst_36 = arith.constant dense<0.000000e+00> : vector<8x8xf32>
    %82 = tpu.matmul %81, %65, %cst_36 {dimension_numbers = #tpu.dot_dimension_numbers<[1], [0], [0], [1], [0, 0, 1, 1], [], []>} : vector<8x8xf32>, vector<8x8xf32>, vector<8x8xf32> -> vector<8x8xf32>
    %83 = vector.extract_strided_slice %23 {offsets = [0, 0, 8], sizes = [1, 8, 8], strides = [1, 1, 1]} : vector<2x8x32xf32> to vector<1x8x8xf32>
    %84 = vector.shape_cast %83 : vector<1x8x8xf32> to vector<8x8xf32>
    %85 = vector.extract_strided_slice %24 {offsets = [0, 0, 8], sizes = [1, 8, 8], strides = [1, 1, 1]} : vector<2x8x32xf32> to vector<1x8x8xf32>
    %86 = vector.shape_cast %85 : vector<1x8x8xf32> to vector<8x8xf32>
    %87 = vector.extract_strided_slice %25 {offsets = [0, 0, 8], sizes = [1, 8, 8], strides = [1, 1, 1]} : vector<2x8x32xf32> to vector<1x8x8xf32>
    %88 = vector.shape_cast %87 : vector<1x8x8xf32> to vector<8x8xf32>
    %cst_37 = arith.constant dense<0.000000e+00> : vector<8x8xf32>
    %89 = tpu.matmul %84, %86, %cst_37 {dimension_numbers = #tpu.dot_dimension_numbers<[1], [1], [0], [0], [0, 0, 1, 0], [], []>} : vector<8x8xf32>, vector<8x8xf32>, vector<8x8xf32> -> vector<8x8xf32>
    %cst_38 = arith.constant 0.353553385 : f32
    %90 = vector.broadcast %cst_38 : f32 to vector<8x8xf32>
    %91 = arith.mulf %89, %90 : vector<8x8xf32>
    %92 = arith.addf %91, %59 : vector<8x8xf32>
    %cst_39 = arith.constant -1.000000e+09 : f32
    %93 = vector.broadcast %cst_39 : f32 to vector<8x8xf32>
    %94 = arith.select %57, %93, %92 : vector<8x8xi1>, vector<8x8xf32>
    %cst_40 = arith.constant dense<0xFF800000> : vector<8xf32>
    %95 = vector.multi_reduction <maximumf>, %94, %cst_40 [1] : vector<8x8xf32> to vector<8xf32>
    %96 = vector.shape_cast %95 : vector<8xf32> to vector<8x1xf32>
    %97 = vector.broadcast %96 : vector<8x1xf32> to vector<8x8xf32>
    %98 = arith.subf %94, %97 : vector<8x8xf32>
    %99 = math.exp %98 : vector<8x8xf32>
    %cst_41 = arith.constant dense<0.000000e+00> : vector<8xf32>
    %100 = vector.multi_reduction <add>, %99, %cst_41 [1] : vector<8x8xf32> to vector<8xf32>
    %101 = vector.shape_cast %100 : vector<8xf32> to vector<8x1xf32>
    %102 = tpu.reciprocal %101 : vector<8x1xf32> -> vector<8x1xf32>
    %103 = vector.broadcast %102 : vector<8x1xf32> to vector<8x8xf32>
    %104 = arith.mulf %99, %103 : vector<8x8xf32>
    %cst_42 = arith.constant dense<0.000000e+00> : vector<8x8xf32>
    %105 = tpu.matmul %104, %88, %cst_42 {dimension_numbers = #tpu.dot_dimension_numbers<[1], [0], [0], [1], [0, 0, 1, 1], [], []>} : vector<8x8xf32>, vector<8x8xf32>, vector<8x8xf32> -> vector<8x8xf32>
    %106 = vector.extract_strided_slice %23 {offsets = [0, 0, 16], sizes = [1, 8, 8], strides = [1, 1, 1]} : vector<2x8x32xf32> to vector<1x8x8xf32>
    %107 = vector.shape_cast %106 : vector<1x8x8xf32> to vector<8x8xf32>
    %108 = vector.extract_strided_slice %24 {offsets = [0, 0, 16], sizes = [1, 8, 8], strides = [1, 1, 1]} : vector<2x8x32xf32> to vector<1x8x8xf32>
    %109 = vector.shape_cast %108 : vector<1x8x8xf32> to vector<8x8xf32>
    %110 = vector.extract_strided_slice %25 {offsets = [0, 0, 16], sizes = [1, 8, 8], strides = [1, 1, 1]} : vector<2x8x32xf32> to vector<1x8x8xf32>
    %111 = vector.shape_cast %110 : vector<1x8x8xf32> to vector<8x8xf32>
    %cst_43 = arith.constant dense<0.000000e+00> : vector<8x8xf32>
    %112 = tpu.matmul %107, %109, %cst_43 {dimension_numbers = #tpu.dot_dimension_numbers<[1], [1], [0], [0], [0, 0, 1, 0], [], []>} : vector<8x8xf32>, vector<8x8xf32>, vector<8x8xf32> -> vector<8x8xf32>
    %cst_44 = arith.constant 0.353553385 : f32
    %113 = vector.broadcast %cst_44 : f32 to vector<8x8xf32>
    %114 = arith.mulf %112, %113 : vector<8x8xf32>
    %115 = arith.addf %114, %59 : vector<8x8xf32>
    %cst_45 = arith.constant -1.000000e+09 : f32
    %116 = vector.broadcast %cst_45 : f32 to vector<8x8xf32>
    %117 = arith.select %57, %116, %115 : vector<8x8xi1>, vector<8x8xf32>
    %cst_46 = arith.constant dense<0xFF800000> : vector<8xf32>
    %118 = vector.multi_reduction <maximumf>, %117, %cst_46 [1] : vector<8x8xf32> to vector<8xf32>
    %119 = vector.shape_cast %118 : vector<8xf32> to vector<8x1xf32>
    %120 = vector.broadcast %119 : vector<8x1xf32> to vector<8x8xf32>
    %121 = arith.subf %117, %120 : vector<8x8xf32>
    %122 = math.exp %121 : vector<8x8xf32>
    %cst_47 = arith.constant dense<0.000000e+00> : vector<8xf32>
    %123 = vector.multi_reduction <add>, %122, %cst_47 [1] : vector<8x8xf32> to vector<8xf32>
    %124 = vector.shape_cast %123 : vector<8xf32> to vector<8x1xf32>
    %125 = tpu.reciprocal %124 : vector<8x1xf32> -> vector<8x1xf32>
    %126 = vector.broadcast %125 : vector<8x1xf32> to vector<8x8xf32>
    %127 = arith.mulf %122, %126 : vector<8x8xf32>
    %cst_48 = arith.constant dense<0.000000e+00> : vector<8x8xf32>
    %128 = tpu.matmul %127, %111, %cst_48 {dimension_numbers = #tpu.dot_dimension_numbers<[1], [0], [0], [1], [0, 0, 1, 1], [], []>} : vector<8x8xf32>, vector<8x8xf32>, vector<8x8xf32> -> vector<8x8xf32>
    %129 = vector.extract_strided_slice %23 {offsets = [0, 0, 24], sizes = [1, 8, 8], strides = [1, 1, 1]} : vector<2x8x32xf32> to vector<1x8x8xf32>
    %130 = vector.shape_cast %129 : vector<1x8x8xf32> to vector<8x8xf32>
    %131 = vector.extract_strided_slice %24 {offsets = [0, 0, 24], sizes = [1, 8, 8], strides = [1, 1, 1]} : vector<2x8x32xf32> to vector<1x8x8xf32>
    %132 = vector.shape_cast %131 : vector<1x8x8xf32> to vector<8x8xf32>
    %133 = vector.extract_strided_slice %25 {offsets = [0, 0, 24], sizes = [1, 8, 8], strides = [1, 1, 1]} : vector<2x8x32xf32> to vector<1x8x8xf32>
    %134 = vector.shape_cast %133 : vector<1x8x8xf32> to vector<8x8xf32>
    %cst_49 = arith.constant dense<0.000000e+00> : vector<8x8xf32>
    %135 = tpu.matmul %130, %132, %cst_49 {dimension_numbers = #tpu.dot_dimension_numbers<[1], [1], [0], [0], [0, 0, 1, 0], [], []>} : vector<8x8xf32>, vector<8x8xf32>, vector<8x8xf32> -> vector<8x8xf32>
    %cst_50 = arith.constant 0.353553385 : f32
    %136 = vector.broadcast %cst_50 : f32 to vector<8x8xf32>
    %137 = arith.mulf %135, %136 : vector<8x8xf32>
    %138 = arith.addf %137, %59 : vector<8x8xf32>
    %cst_51 = arith.constant -1.000000e+09 : f32
    %139 = vector.broadcast %cst_51 : f32 to vector<8x8xf32>
    %140 = arith.select %57, %139, %138 : vector<8x8xi1>, vector<8x8xf32>
    %cst_52 = arith.constant dense<0xFF800000> : vector<8xf32>
    %141 = vector.multi_reduction <maximumf>, %140, %cst_52 [1] : vector<8x8xf32> to vector<8xf32>
    %142 = vector.shape_cast %141 : vector<8xf32> to vector<8x1xf32>
    %143 = vector.broadcast %142 : vector<8x1xf32> to vector<8x8xf32>
    %144 = arith.subf %140, %143 : vector<8x8xf32>
    %145 = math.exp %144 : vector<8x8xf32>
    %cst_53 = arith.constant dense<0.000000e+00> : vector<8xf32>
    %146 = vector.multi_reduction <add>, %145, %cst_53 [1] : vector<8x8xf32> to vector<8xf32>
    %147 = vector.shape_cast %146 : vector<8xf32> to vector<8x1xf32>
    %148 = tpu.reciprocal %147 : vector<8x1xf32> -> vector<8x1xf32>
    %149 = vector.broadcast %148 : vector<8x1xf32> to vector<8x8xf32>
    %150 = arith.mulf %145, %149 : vector<8x8xf32>
    %cst_54 = arith.constant dense<0.000000e+00> : vector<8x8xf32>
    %151 = tpu.matmul %150, %134, %cst_54 {dimension_numbers = #tpu.dot_dimension_numbers<[1], [0], [0], [1], [0, 0, 1, 1], [], []>} : vector<8x8xf32>, vector<8x8xf32>, vector<8x8xf32> -> vector<8x8xf32>
    %152 = tpu.concatenate %82, %105, %128, %151 in 1 : vector<8x8xf32>, vector<8x8xf32>, vector<8x8xf32>, vector<8x8xf32> -> vector<8x32xf32>
    %153 = vector.extract_strided_slice %53 {offsets = [1, 0, 0], sizes = [1, 8, 8], strides = [1, 1, 1]} : vector<2x8x8xf32> to vector<1x8x8xf32>
    %154 = vector.shape_cast %153 : vector<1x8x8xf32> to vector<8x8xf32>
    %cst_55 = arith.constant 0.000000e+00 : f32
    %155 = vector.broadcast %cst_55 : f32 to vector<8x8xf32>
    %156 = arith.cmpf oeq, %154, %155 : vector<8x8xf32>
    %157 = vector.extract_strided_slice %51 {offsets = [1, 0, 0], sizes = [1, 8, 8], strides = [1, 1, 1]} : vector<2x8x8xf32> to vector<1x8x8xf32>
    %158 = vector.shape_cast %157 : vector<1x8x8xf32> to vector<8x8xf32>
    %159 = vector.extract_strided_slice %23 {offsets = [1, 0, 0], sizes = [1, 8, 8], strides = [1, 1, 1]} : vector<2x8x32xf32> to vector<1x8x8xf32>
    %160 = vector.shape_cast %159 : vector<1x8x8xf32> to vector<8x8xf32>
    %161 = vector.extract_strided_slice %24 {offsets = [1, 0, 0], sizes = [1, 8, 8], strides = [1, 1, 1]} : vector<2x8x32xf32> to vector<1x8x8xf32>
    %162 = vector.shape_cast %161 : vector<1x8x8xf32> to vector<8x8xf32>
    %163 = vector.extract_strided_slice %25 {offsets = [1, 0, 0], sizes = [1, 8, 8], strides = [1, 1, 1]} : vector<2x8x32xf32> to vector<1x8x8xf32>
    %164 = vector.shape_cast %163 : vector<1x8x8xf32> to vector<8x8xf32>
    %cst_56 = arith.constant dense<0.000000e+00> : vector<8x8xf32>
    %165 = tpu.matmul %160, %162, %cst_56 {dimension_numbers = #tpu.dot_dimension_numbers<[1], [1], [0], [0], [0, 0, 1, 0], [], []>} : vector<8x8xf32>, vector<8x8xf32>, vector<8x8xf32> -> vector<8x8xf32>
    %cst_57 = arith.constant 0.353553385 : f32
    %166 = vector.broadcast %cst_57 : f32 to vector<8x8xf32>
    %167 = arith.mulf %165, %166 : vector<8x8xf32>
    %168 = arith.addf %167, %158 : vector<8x8xf32>
    %cst_58 = arith.constant -1.000000e+09 : f32
    %169 = vector.broadcast %cst_58 : f32 to vector<8x8xf32>
    %170 = arith.select %156, %169, %168 : vector<8x8xi1>, vector<8x8xf32>
    %cst_59 = arith.constant dense<0xFF800000> : vector<8xf32>
    %171 = vector.multi_reduction <maximumf>, %170, %cst_59 [1] : vector<8x8xf32> to vector<8xf32>
    %172 = vector.shape_cast %171 : vector<8xf32> to vector<8x1xf32>
    %173 = vector.broadcast %172 : vector<8x1xf32> to vector<8x8xf32>
    %174 = arith.subf %170, %173 : vector<8x8xf32>
    %175 = math.exp %174 : vector<8x8xf32>
    %cst_60 = arith.constant dense<0.000000e+00> : vector<8xf32>
    %176 = vector.multi_reduction <add>, %175, %cst_60 [1] : vector<8x8xf32> to vector<8xf32>
    %177 = vector.shape_cast %176 : vector<8xf32> to vector<8x1xf32>
    %178 = tpu.reciprocal %177 : vector<8x1xf32> -> vector<8x1xf32>
    %179 = vector.broadcast %178 : vector<8x1xf32> to vector<8x8xf32>
    %180 = arith.mulf %175, %179 : vector<8x8xf32>
    %cst_61 = arith.constant dense<0.000000e+00> : vector<8x8xf32>
    %181 = tpu.matmul %180, %164, %cst_61 {dimension_numbers = #tpu.dot_dimension_numbers<[1], [0], [0], [1], [0, 0, 1, 1], [], []>} : vector<8x8xf32>, vector<8x8xf32>, vector<8x8xf32> -> vector<8x8xf32>
    %182 = vector.extract_strided_slice %23 {offsets = [1, 0, 8], sizes = [1, 8, 8], strides = [1, 1, 1]} : vector<2x8x32xf32> to vector<1x8x8xf32>
    %183 = vector.shape_cast %182 : vector<1x8x8xf32> to vector<8x8xf32>
    %184 = vector.extract_strided_slice %24 {offsets = [1, 0, 8], sizes = [1, 8, 8], strides = [1, 1, 1]} : vector<2x8x32xf32> to vector<1x8x8xf32>
    %185 = vector.shape_cast %184 : vector<1x8x8xf32> to vector<8x8xf32>
    %186 = vector.extract_strided_slice %25 {offsets = [1, 0, 8], sizes = [1, 8, 8], strides = [1, 1, 1]} : vector<2x8x32xf32> to vector<1x8x8xf32>
    %187 = vector.shape_cast %186 : vector<1x8x8xf32> to vector<8x8xf32>
    %cst_62 = arith.constant dense<0.000000e+00> : vector<8x8xf32>
    %188 = tpu.matmul %183, %185, %cst_62 {dimension_numbers = #tpu.dot_dimension_numbers<[1], [1], [0], [0], [0, 0, 1, 0], [], []>} : vector<8x8xf32>, vector<8x8xf32>, vector<8x8xf32> -> vector<8x8xf32>
    %cst_63 = arith.constant 0.353553385 : f32
    %189 = vector.broadcast %cst_63 : f32 to vector<8x8xf32>
    %190 = arith.mulf %188, %189 : vector<8x8xf32>
    %191 = arith.addf %190, %158 : vector<8x8xf32>
    %cst_64 = arith.constant -1.000000e+09 : f32
    %192 = vector.broadcast %cst_64 : f32 to vector<8x8xf32>
    %193 = arith.select %156, %192, %191 : vector<8x8xi1>, vector<8x8xf32>
    %cst_65 = arith.constant dense<0xFF800000> : vector<8xf32>
    %194 = vector.multi_reduction <maximumf>, %193, %cst_65 [1] : vector<8x8xf32> to vector<8xf32>
    %195 = vector.shape_cast %194 : vector<8xf32> to vector<8x1xf32>
    %196 = vector.broadcast %195 : vector<8x1xf32> to vector<8x8xf32>
    %197 = arith.subf %193, %196 : vector<8x8xf32>
    %198 = math.exp %197 : vector<8x8xf32>
    %cst_66 = arith.constant dense<0.000000e+00> : vector<8xf32>
    %199 = vector.multi_reduction <add>, %198, %cst_66 [1] : vector<8x8xf32> to vector<8xf32>
    %200 = vector.shape_cast %199 : vector<8xf32> to vector<8x1xf32>
    %201 = tpu.reciprocal %200 : vector<8x1xf32> -> vector<8x1xf32>
    %202 = vector.broadcast %201 : vector<8x1xf32> to vector<8x8xf32>
    %203 = arith.mulf %198, %202 : vector<8x8xf32>
    %cst_67 = arith.constant dense<0.000000e+00> : vector<8x8xf32>
    %204 = tpu.matmul %203, %187, %cst_67 {dimension_numbers = #tpu.dot_dimension_numbers<[1], [0], [0], [1], [0, 0, 1, 1], [], []>} : vector<8x8xf32>, vector<8x8xf32>, vector<8x8xf32> -> vector<8x8xf32>
    %205 = vector.extract_strided_slice %23 {offsets = [1, 0, 16], sizes = [1, 8, 8], strides = [1, 1, 1]} : vector<2x8x32xf32> to vector<1x8x8xf32>
    %206 = vector.shape_cast %205 : vector<1x8x8xf32> to vector<8x8xf32>
    %207 = vector.extract_strided_slice %24 {offsets = [1, 0, 16], sizes = [1, 8, 8], strides = [1, 1, 1]} : vector<2x8x32xf32> to vector<1x8x8xf32>
    %208 = vector.shape_cast %207 : vector<1x8x8xf32> to vector<8x8xf32>
    %209 = vector.extract_strided_slice %25 {offsets = [1, 0, 16], sizes = [1, 8, 8], strides = [1, 1, 1]} : vector<2x8x32xf32> to vector<1x8x8xf32>
    %210 = vector.shape_cast %209 : vector<1x8x8xf32> to vector<8x8xf32>
    %cst_68 = arith.constant dense<0.000000e+00> : vector<8x8xf32>
    %211 = tpu.matmul %206, %208, %cst_68 {dimension_numbers = #tpu.dot_dimension_numbers<[1], [1], [0], [0], [0, 0, 1, 0], [], []>} : vector<8x8xf32>, vector<8x8xf32>, vector<8x8xf32> -> vector<8x8xf32>
    %cst_69 = arith.constant 0.353553385 : f32
    %212 = vector.broadcast %cst_69 : f32 to vector<8x8xf32>
    %213 = arith.mulf %211, %212 : vector<8x8xf32>
    %214 = arith.addf %213, %158 : vector<8x8xf32>
    %cst_70 = arith.constant -1.000000e+09 : f32
    %215 = vector.broadcast %cst_70 : f32 to vector<8x8xf32>
    %216 = arith.select %156, %215, %214 : vector<8x8xi1>, vector<8x8xf32>
    %cst_71 = arith.constant dense<0xFF800000> : vector<8xf32>
    %217 = vector.multi_reduction <maximumf>, %216, %cst_71 [1] : vector<8x8xf32> to vector<8xf32>
    %218 = vector.shape_cast %217 : vector<8xf32> to vector<8x1xf32>
    %219 = vector.broadcast %218 : vector<8x1xf32> to vector<8x8xf32>
    %220 = arith.subf %216, %219 : vector<8x8xf32>
    %221 = math.exp %220 : vector<8x8xf32>
    %cst_72 = arith.constant dense<0.000000e+00> : vector<8xf32>
    %222 = vector.multi_reduction <add>, %221, %cst_72 [1] : vector<8x8xf32> to vector<8xf32>
    %223 = vector.shape_cast %222 : vector<8xf32> to vector<8x1xf32>
    %224 = tpu.reciprocal %223 : vector<8x1xf32> -> vector<8x1xf32>
    %225 = vector.broadcast %224 : vector<8x1xf32> to vector<8x8xf32>
    %226 = arith.mulf %221, %225 : vector<8x8xf32>
    %cst_73 = arith.constant dense<0.000000e+00> : vector<8x8xf32>
    %227 = tpu.matmul %226, %210, %cst_73 {dimension_numbers = #tpu.dot_dimension_numbers<[1], [0], [0], [1], [0, 0, 1, 1], [], []>} : vector<8x8xf32>, vector<8x8xf32>, vector<8x8xf32> -> vector<8x8xf32>
    %228 = vector.extract_strided_slice %23 {offsets = [1, 0, 24], sizes = [1, 8, 8], strides = [1, 1, 1]} : vector<2x8x32xf32> to vector<1x8x8xf32>
    %229 = vector.shape_cast %228 : vector<1x8x8xf32> to vector<8x8xf32>
    %230 = vector.extract_strided_slice %24 {offsets = [1, 0, 24], sizes = [1, 8, 8], strides = [1, 1, 1]} : vector<2x8x32xf32> to vector<1x8x8xf32>
    %231 = vector.shape_cast %230 : vector<1x8x8xf32> to vector<8x8xf32>
    %232 = vector.extract_strided_slice %25 {offsets = [1, 0, 24], sizes = [1, 8, 8], strides = [1, 1, 1]} : vector<2x8x32xf32> to vector<1x8x8xf32>
    %233 = vector.shape_cast %232 : vector<1x8x8xf32> to vector<8x8xf32>
    %cst_74 = arith.constant dense<0.000000e+00> : vector<8x8xf32>
    %234 = tpu.matmul %229, %231, %cst_74 {dimension_numbers = #tpu.dot_dimension_numbers<[1], [1], [0], [0], [0, 0, 1, 0], [], []>} : vector<8x8xf32>, vector<8x8xf32>, vector<8x8xf32> -> vector<8x8xf32>
    %cst_75 = arith.constant 0.353553385 : f32
    %235 = vector.broadcast %cst_75 : f32 to vector<8x8xf32>
    %236 = arith.mulf %234, %235 : vector<8x8xf32>
    %237 = arith.addf %236, %158 : vector<8x8xf32>
    %cst_76 = arith.constant -1.000000e+09 : f32
    %238 = vector.broadcast %cst_76 : f32 to vector<8x8xf32>
    %239 = arith.select %156, %238, %237 : vector<8x8xi1>, vector<8x8xf32>
    %cst_77 = arith.constant dense<0xFF800000> : vector<8xf32>
    %240 = vector.multi_reduction <maximumf>, %239, %cst_77 [1] : vector<8x8xf32> to vector<8xf32>
    %241 = vector.shape_cast %240 : vector<8xf32> to vector<8x1xf32>
    %242 = vector.broadcast %241 : vector<8x1xf32> to vector<8x8xf32>
    %243 = arith.subf %239, %242 : vector<8x8xf32>
    %244 = math.exp %243 : vector<8x8xf32>
    %cst_78 = arith.constant dense<0.000000e+00> : vector<8xf32>
    %245 = vector.multi_reduction <add>, %244, %cst_78 [1] : vector<8x8xf32> to vector<8xf32>
    %246 = vector.shape_cast %245 : vector<8xf32> to vector<8x1xf32>
    %247 = tpu.reciprocal %246 : vector<8x1xf32> -> vector<8x1xf32>
    %248 = vector.broadcast %247 : vector<8x1xf32> to vector<8x8xf32>
    %249 = arith.mulf %244, %248 : vector<8x8xf32>
    %cst_79 = arith.constant dense<0.000000e+00> : vector<8x8xf32>
    %250 = tpu.matmul %249, %233, %cst_79 {dimension_numbers = #tpu.dot_dimension_numbers<[1], [0], [0], [1], [0, 0, 1, 1], [], []>} : vector<8x8xf32>, vector<8x8xf32>, vector<8x8xf32> -> vector<8x8xf32>
    %251 = tpu.concatenate %181, %204, %227, %250 in 1 : vector<8x8xf32>, vector<8x8xf32>, vector<8x8xf32>, vector<8x8xf32> -> vector<8x32xf32>
    %252 = tpu.concatenate %152, %251 in 0 : vector<8x32xf32>, vector<8x32xf32> -> vector<16x32xf32>
    %c0_80 = arith.constant 0 : index
    %c0_81 = arith.constant 0 : index
    %253 = vector.load %arg7[%c0_80, %c0_81] : memref<32x32xf32, #tpu.memory_space<vmem>>, vector<32x32xf32>
    %cst_82 = arith.constant dense<0.000000e+00> : vector<16x32xf32>
    %254 = tpu.matmul %252, %253, %cst_82 {dimension_numbers = #tpu.dot_dimension_numbers<[1], [0], [0], [1], [0, 0, 1, 1], [], []>} : vector<16x32xf32>, vector<32x32xf32>, vector<16x32xf32> -> vector<16x32xf32>
    %c0_83 = arith.constant 0 : index
    %c0_84 = arith.constant 0 : index
    %255 = vector.load %arg8[%c0_83, %c0_84] : memref<1x32xf32, #tpu.memory_space<vmem>>, vector<1x32xf32>
    %256 = vector.broadcast %255 : vector<1x32xf32> to vector<16x32xf32>
    %257 = arith.addf %254, %256 : vector<16x32xf32>
    %258 = vector.shape_cast %257 : vector<16x32xf32> to vector<2x8x32xf32>
    %c0_85 = arith.constant 0 : index
    %c0_86 = arith.constant 0 : index
    %c0_87 = arith.constant 0 : index
    %259 = vector.load %arg12[%c0_85, %c0_86, %c0_87] : memref<2x8x32xf32, #tpu.memory_space<vmem>>, vector<2x8x32xf32>
    tpu.vector_store %arg12[%c0_85, %c0_86, %c0_87], %258 {strides = array<i32>} : memref<2x8x32xf32, #tpu.memory_space<vmem>>, vector<2x8x32xf32>,
    return
  }
  func.func @transform_0(%arg0: i32) -> i32 {
    %c0_i32 = arith.constant 0 : i32
    %c0_i32_0 = arith.constant 0 : i32
    return %c0_i32 : i32
  }
  func.func @transform_1(%arg0: i32) -> (i32, i32, i32) {
    %c0_i32 = arith.constant 0 : i32
    %c0_i32_0 = arith.constant 0 : i32
    %c0_i32_1 = arith.constant 0 : i32
    return %arg0, %c0_i32, %c0_i32_0 : i32, i32, i32
  }
  func.func @transform_2(%arg0: i32) -> (i32, i32, i32) {
    %c0_i32 = arith.constant 0 : i32
    %c0_i32_0 = arith.constant 0 : i32
    %c0_i32_1 = arith.constant 0 : i32
    return %arg0, %c0_i32, %c0_i32_0 : i32, i32, i32
  }
  func.func @transform_3(%arg0: i32) -> (i32, i32, i32) {
    %c0_i32 = arith.constant 0 : i32
    %c0_i32_0 = arith.constant 0 : i32
    %c0_i32_1 = arith.constant 0 : i32
    return %arg0, %c0_i32, %c0_i32_0 : i32, i32, i32
  }
  func.func @transform_4(%arg0: i32) -> (i32, i32) {
    %c0_i32 = arith.constant 0 : i32
    %c0_i32_0 = arith.constant 0 : i32
    %c0_i32_1 = arith.constant 0 : i32
    return %c0_i32, %c0_i32_0 : i32, i32
  }
  func.func @transform_5(%arg0: i32) -> (i32, i32) {
    %c0_i32 = arith.constant 0 : i32
    %c0_i32_0 = arith.constant 0 : i32
    %c0_i32_1 = arith.constant 0 : i32
    return %c0_i32, %c0_i32_0 : i32, i32
  }
  func.func @transform_6(%arg0: i32) -> (i32, i32) {
    %c0_i32 = arith.constant 0 : i32
    %c0_i32_0 = arith.constant 0 : i32
    %c0_i32_1 = arith.constant 0 : i32
    return %c0_i32, %c0_i32_0 : i32, i32
  }
  func.func @transform_7(%arg0: i32) -> (i32, i32) {
    %c0_i32 = arith.constant 0 : i32
    %c0_i32_0 = arith.constant 0 : i32
    %c0_i32_1 = arith.constant 0 : i32
    return %c0_i32, %c0_i32_0 : i32, i32
  }
  func.func @transform_8(%arg0: i32) -> (i32, i32, i32) {
    %c0_i32 = arith.constant 0 : i32
    %c0_i32_0 = arith.constant 0 : i32
    %c0_i32_1 = arith.constant 0 : i32
    return %arg0, %c0_i32, %c0_i32_0 : i32, i32, i32
  }
  func.func @transform_9(%arg0: i32) -> (i32, i32, i32) {
    %c0_i32 = arith.constant 0 : i32
    %c0_i32_0 = arith.constant 0 : i32
    %c0_i32_1 = arith.constant 0 : i32
    return %arg0, %c0_i32, %c0_i32_0 : i32, i32, i32
  }
  func.func @transform_10(%arg0: i32) -> (i32, i32, i32) {
    %c0_i32 = arith.constant 0 : i32
    %c0_i32_0 = arith.constant 0 : i32
    %c0_i32_1 = arith.constant 0 : i32
    return %arg0, %c0_i32, %c0_i32_0 : i32, i32, i32
  }
  func.func @transform_11(%arg0: i32) -> (i32, i32, i32) {
    %c0_i32 = arith.constant 0 : i32
    %c0_i32_0 = arith.constant 0 : i32
    %c0_i32_1 = arith.constant 0 : i32
    return %arg0, %c0_i32, %c0_i32_0 : i32, i32, i32
  }
}

</mosaic_0001>

<bundles_post_ra>
// kernel: multi_head_attention.1
= control target key start
LH: loop header
LB: loop body
LE: loop exit
PB: predicated region body
PF: predicated region fallthrough
CT: control target
= control target key end

     0   :  { %16 = vsyncpa [#allocation5], 0  ;;  %s2869_s0 = inlined_call_operand.vmem [shape: f32[3], index: 0, kind: input, shape index: {}]   ;;  %s2870_s1 = inlined_call_operand.vmem [shape: f32[2,8,32], index: 1, kind: input, shape index: {}]   ;;  %s2871_s2 = inlined_call_operand.hbm [shape: f32[2,8,32], index: 2, kind: input, shape index: {}]   ;;  %s2872_s3 = inlined_call_operand.hbm [shape: f32[2,8,32], index: 3, kind: input, shape index: {}]   ;;  %s2873_s4 = inlined_call_operand.vmem [shape: f32[32,96], index: 4, kind: input, shape index: {}]   ;;  %s2874_s5 = inlined_call_operand.vmem [shape: f32[1,96], index: 5, kind: input, shape index: {}]   ;;  %s2875_s6 = inlined_call_operand.hbm [shape: f32[32,32], index: 6, kind: input, shape index: {}]   ;;  %s2876_s7 = inlined_call_operand.vmem [shape: f32[1,32], index: 7, kind: input, shape index: {}]   ;;  %s2877_s8 = inlined_call_operand.hbm [shape: f32[2,8,8], index: 8, kind: input, shape index: {}]   ;;  %s2878_s9 = inlined_call_operand.hbm [shape: f32[2,8,8], index: 9, kind: input, shape index: {}]   ;;  %s2879_s10 = inlined_call_operand.vmem [shape: s8[2,8,8], index: 10, kind: input, shape index: {}]   ;;  %s2880_s11 = inlined_call_operand.hbm [shape: f32[2,8,32], index: 11, kind: output, shape index: {}]  }
   0x1   :  { %17 = vsyncpa [#allocation3], 0 }
   0x2   :  { %18 = vsyncpa [#allocation8], 0 }
   0x3   :  { %19 = vsyncpa [#allocation11], 0 }
   0x4   :  { %20 = vsyncpa [#allocation4], 0  ;;  %s2436_s17 = smov [#allocation7]   ;;  %s2437_s19 = smov [#allocation10]  }
   0x5   :  { %s50_s18 = sshll.u32 %s2436_s17, 4  ;;  %s80_s20 = sshll.u32 %s2437_s19, 4  ;;  %s51_s18 = int_to_ptr.vmem [resolvable:$true] %s50_s18  ;;  %s2514_s20 = int_to_ptr.vmem [resolvable:$true] %s80_s20 }
   0x6   :  { %s2282_s23 = scalar_lea.hbm %s2872_s3, 256 }
   0x7   :  { %p2283_p0 = scmp.ne.s32.totalorder %s2872_s3, %s2282_s23  ;;  %p2286_p1 = scmp.lt.u32.totalorder %s2282_s23, %s2872_s3 }
   0x9   :  { %p2288_p2 = pnand %p2286_p1, %p2283_p0 }
   0xb   :  { %2291 = shalt.err (!%p2288_p2)
}
   0xc   :  { %s2292_s28 = scalar_lea.vmem %s51_s18, 256  ;;  %p2297_p4 = scmp.lt.s32.totalorder %s51_s18, %s51_s18 }
   0xd   :  { %p2293_p3 = scmp.ne.s32.totalorder %s51_s18, %s2292_s28  ;;  %p2298_p5 = scmp.lt.s32.totalorder %s2292_s28, %s2292_s28 }
   0xf   :  { %p2299_p6 = por %p2298_p5, %p2297_p4 }
  0x11   :  { %p2300_p7 = pnand %p2299_p6, %p2293_p3 }
  0x13   :  { %2303 = shalt.err (!%p2300_p7)
}
  0x14   :  { %s2438_s29 = smov 128   ;;  %s2439_s30 = smov 8  }
  0x15   :  { %56 = dma.hbm_to_vmem [thread:$0]  %s2872_s3, 256, %s51_s18, [#allocation8], %s2438_s29, %s2438_s29, %s2439_s30  }
  0x16   :  { %s2304_s16 = scalar_lea.hbm %s2877_s8, 256 }
  0x17   :  { %p2305_p8 = scmp.ne.s32.totalorder %s2877_s8, %s2304_s16  ;;  %p2308_p9 = scmp.lt.u32.totalorder %s2304_s16, %s2877_s8 }
  0x19   :  { %p2310_p10 = pnand %p2308_p9, %p2305_p8 }
  0x1b   :  { %2313 = shalt.err (!%p2310_p10)
}
  0x1c   :  { %s2314_s23 = scalar_lea.vmem %s2514_s20, 256  ;;  %p2319_p12 = scmp.lt.s32.totalorder %s2514_s20, %s2514_s20 }
  0x1d   :  { %p2315_p11 = scmp.ne.s32.totalorder %s2514_s20, %s2314_s23  ;;  %p2320_p13 = scmp.lt.s32.totalorder %s2314_s23, %s2314_s23 }
  0x1f   :  { %p2321_p0 = por %p2320_p13, %p2319_p12 }
  0x21   :  { %p2322_p1 = pnand %p2321_p0, %p2315_p11 }
  0x23   :  { %2325 = shalt.err (!%p2322_p1)
}
  0x24   :  { %86 = dma.hbm_to_vmem [thread:$0]  %s2877_s8, 256, %s2514_s20, [#allocation11], %s2438_s29, %s2438_s29, %s2439_s30  }
  0x25   :  { %s27_s26 = sshll.u32 %s2869_s0, 4  ;;  %s28_s26 = int_to_ptr.vmem [resolvable:$true] %s27_s26 }
  0x26   :  { %s2326_s27 = scalar_lea.vmem %s28_s26, 16  ;;  %p2331_p3 = scmp.lt.s32.totalorder %s28_s26, %s28_s26 }
  0x27   :  { %p2327_p2 = scmp.ne.s32.totalorder %s28_s26, %s2326_s27  ;;  %p2332_p4 = scmp.lt.s32.totalorder %s2326_s27, %s2326_s27 }
  0x29   :  { %p2333_p5 = por %p2332_p4, %p2331_p3 }
  0x2b   :  { %p2334_p6 = pnand %p2333_p5, %p2327_p2 }
  0x2d   :  { %2337 = shalt.err (!%p2334_p6)
}
  0x2e   :  { %s2440_s28 = smov [#allocation2]   ;;  %s2441_s12 = smov [#allocation6]  }
  0x2f   :  { %30 = dma.vmem_to_smem %s28_s26, 16, %s2440_s28, [#allocation5]  }
  0x30   :  { %s38_s13 = sshll.u32 %s2441_s12, 4  ;;  %s2442_s14 = smov [#allocation9]   ;;  %s39_s13 = int_to_ptr.vmem [resolvable:$true] %s38_s13 }
  0x31   :  { %s66_s15 = sshll.u32 %s2442_s14, 4  ;;  %s2338_s16 = scalar_lea.hbm %s2871_s2, 256  ;;  %s67_s15 = int_to_ptr.vmem [resolvable:$true] %s66_s15 }
  0x32   :  { %p2339_p7 = scmp.ne.s32.totalorder %s2871_s2, %s2338_s16  ;;  %p2342_p8 = scmp.lt.u32.totalorder %s2338_s16, %s2871_s2 }
  0x34   :  { %p2344_p9 = pnand %p2342_p8, %p2339_p7 }
  0x36   :  { %2347 = shalt.err (!%p2344_p9)
}
  0x37   :  { %s2348_s22 = scalar_lea.vmem %s39_s13, 256  ;;  %p2353_p11 = scmp.lt.s32.totalorder %s39_s13, %s39_s13 }
  0x38   :  { %p2349_p10 = scmp.ne.s32.totalorder %s39_s13, %s2348_s22  ;;  %p2354_p12 = scmp.lt.s32.totalorder %s2348_s22, %s2348_s22 }
  0x3a   :  { %p2355_p13 = por %p2354_p12, %p2353_p11 }
  0x3c   :  { %p2356_p0 = pnand %p2355_p13, %p2349_p10 }
  0x3e   :  { %2359 = shalt.err (!%p2356_p0)
}
  0x3f   :  { %44 = dma.hbm_to_vmem [thread:$0]  %s2871_s2, 256, %s39_s13, [#allocation3], %s2438_s29, %s2438_s29, %s2439_s30  }
  0x40   :  { %s2360_s25 = scalar_lea.hbm %s2875_s6, 512 }
  0x41   :  { %p2361_p1 = scmp.ne.s32.totalorder %s2875_s6, %s2360_s25  ;;  %p2364_p2 = scmp.lt.u32.totalorder %s2360_s25, %s2875_s6 }
  0x43   :  { %p2366_p3 = pnand %p2364_p2, %p2361_p1 }
  0x45   :  { %2369 = shalt.err (!%p2366_p3)
}
  0x46   :  { %s2370_s14 = scalar_lea.vmem %s67_s15, 512  ;;  %p2375_p5 = scmp.lt.s32.totalorder %s67_s15, %s67_s15 }
  0x47   :  { %p2371_p4 = scmp.ne.s32.totalorder %s67_s15, %s2370_s14  ;;  %p2376_p6 = scmp.lt.s32.totalorder %s2370_s14, %s2370_s14 }
  0x49   :  { %p2377_p7 = por %p2376_p6, %p2375_p5 }
  0x4b   :  { %p2378_p8 = pnand %p2377_p7, %p2371_p4 }
  0x4d   :  { %2381 = shalt.err (!%p2378_p8)
}
  0x4e   :  { %72 = dma.hbm_to_vmem [thread:$0]  %s2875_s6, 512, %s67_s15, [#allocation8], %s2438_s29, %s2438_s29, %s2439_s30  }
  0x4f   :  { %s2443_s8 = smov [#allocation12]   ;;  %s2382_s17 = scalar_lea.hbm %s2878_s9, 256 }
  0x50   :  { %s92_s20 = sshll.u32 %s2443_s8, 4  ;;  %p2383_p9 = scmp.ne.s32.totalorder %s2878_s9, %s2382_s17  ;;  %s93_s20 = int_to_ptr.vmem [resolvable:$true] %s92_s20 }
  0x51   :  { %p2386_p10 = scmp.lt.u32.totalorder %s2382_s17, %s2878_s9 }
  0x53   :  { %p2388_p11 = pnand %p2386_p10, %p2383_p9 }
  0x55   :  { %2391 = shalt.err (!%p2388_p11)
}
  0x56   :  { %s2392_s3 = scalar_lea.vmem %s93_s20, 256  ;;  %p2397_p13 = scmp.lt.s32.totalorder %s93_s20, %s93_s20 }
  0x57   :  { %p2393_p12 = scmp.ne.s32.totalorder %s93_s20, %s2392_s3  ;;  %p2398_p0 = scmp.lt.s32.totalorder %s2392_s3, %s2392_s3 }
  0x59   :  { %p2399_p1 = por %p2398_p0, %p2397_p13 }
  0x5b   :  { %p2400_p2 = pnand %p2399_p1, %p2393_p12 }
  0x5d   :  { %2403 = shalt.err (!%p2400_p2)
}
  0x5e   :  { %98 = dma.hbm_to_vmem [thread:$0]  %s2878_s9, 256, %s93_s20, [#allocation11], %s2438_s29, %s2438_s29, %s2439_s30  }
  0x5f   :  { %2426 = dma.done.wait [#allocation5], 16  }
  0x60   :  { %2427 = vsyncadd [#allocation5], 4294967280 }
  0x61   :  { %2428 = dma.done.wait [#allocation3], 256  }
  0x62   :  { %2429 = vsyncadd [#allocation3], 4294967040 }
  0x63   :  { %2430 = dma.done.wait [#allocation8], 768  }
  0x64   :  { %2431 = vsyncadd [#allocation8], 4294966528 }
  0x65   :  { %2432 = dma.done.wait [#allocation11], 512  }
  0x66   :  { %2433 = vsyncadd [#allocation11], 4294966784 }
  0x67   :  { %119 = sfence }
  0x68   :  { %v120_v0 = vld [vmem:[%s2873_s4] sm:$0xff]  ;;  %v121_v1 = vld [vmem:[%s2873_s4 + $0x8] sm:$0xff]  ;;  %v122_v2 = vld [vmem:[%s2873_s4 + $0x10] sm:$0xff]  ;;  %vm137_vm0 = vcmask 261120   ;;  %s2444_s20 = smov 96   ;;  %v2445_v21 = vmov 0.0  }
  0x69   :  { %v2214_v3 = vpack.i.bf16 %v121_v1, %v120_v0  ;;  %v123_v4 = vld [vmem:[%s2873_s4 + $0x18] sm:$0xff]  ;;  %v2164_v5 = vpack.c.bf16 %v121_v1, %v120_v0  ;;  %v127_v6 = vld [vmem:[#allocation6] sm:$0xff]  ;;  %v126_v11 = vld [vmem:[%s2870_s1 + $0x8] sm:$0xff]  ;;  %vm2446_vm1 = vmmov 0   ;;  %vm460_vm2 = vcmask 64512   ;;  %s2658_s0 = sld [smem:[#allocation2 + $0x1]] }
  0x6a   :  { %v2168_v7 = vpack.c.bf16 %v123_v4, %v122_v2  ;;  %2059 = vmatprep.mubr.msk.f32.mxu1 %vm137_vm0, %v127_v6  ;;  %v125_v8 = vld [vmem:[%s2870_s1] sm:$0xff]  ;;  %v2219_v10 = vpack.i.bf16 %v123_v4, %v122_v2  ;;  %v128_v20 = vld [vmem:[#allocation6 + $0x8] sm:$0xff]  ;;  %s2447_s1 = smov 64   ;;  %v129_v31 = vld [vmem:[#allocation7] sm:$0xff]  ;;  %s2662_s17 = sld [smem:[#allocation2 + $0x2]]  ;;  %vm1142_vm5 = vcmask 130048  }
  0x6b   :  { %v2618_v9 = vld [vmem:[%s2874_s5] ss:$0 sm:$0xff]  ;;  %2215 = vrot.lane.b32.xlu0 %v2214_v3, %s2444_s20  ;;  %2165 = vmatprep.subr.bf16.mxu0 %v2164_v5  ;;  %v130_v38 = vld [vmem:[#allocation7 + $0x8] sm:$0xff]  ;;  %v427_v40 = vld [vmem:[#allocation12] sm:$0xff]  ;;  %s2656_s5 = sld [smem:[#allocation2]]  ;;  %s2449_s22 = smov 112  }
  0x6c   :  { %2167 = vmatpush3.bf16.msra.mxu0 %v2164_v5  ;;  %2048 = vmatprep.mubr.msk.f32.mxu0 %vm137_vm0, %v125_v8  ;;  %v415_v39 = vld [vmem:[#allocation10] sm:$0xff]  ;;  %v429_v42 = vadd.f32 2.7182817, %v427_v40  ;;  %s2450_s23 = smov 104   ;;  %s2451_s3 = smov 16   ;;  %vm1144_vm6 = vcmask 195584  }
  0x6d   :  { %2169 = vmatprep.subr.bf16.mxu0 %v2168_v7  ;;  %235 = vrot.lane.b32.xlu1 %v2618_v9, %s2444_s20  ;;  %v417_v41 = vadd.f32 2.7182817, %v415_v39  ;;  %v2671_v53 = vld [vmem:[%s2879_s10] sm:$0xf]   ;;  %s2448_s10 = smov 120   ;;  %s2452_s6 = smov 24  }
  0x6e   :  { %v1982_v54 = vunpack.c.0.s8 %v2671_v53  ;;  %s2453_s24 = smov [#allocation13]  }
  0x6f   :  { %2220 = vrot.lane.b32.xlu0 %v2219_v10, %s2444_s20  ;;  %2234 = vlog2.f32 %v417_v41  ;;  %v444_v50 = vstv %s2658_s0  ;;  %s1929_s25 = sshll.u32 %s2453_s24, 4  ;;  %s1930_s25 = int_to_ptr.vmem [resolvable:$true] %s1929_s25 }
  0x70   :  { %2171 = vmatpush3.bf16.msra.mxu0 %v2168_v7  ;;  %2236 = vlog2.f32 %v429_v42  ;;  %v450_v56 = vstv %s2662_s17  ;;  %v2675_v57 = vcvt.s32.f32 %v1982_v54  ;;  %s2404_s26 = scalar_lea.vmem %s1930_s25, 256  ;;  %p2409_p4 = scmp.lt.s32.totalorder %s1930_s25, %s1930_s25 }
  0x71   :  { %2225 = vrot.lane.b32.xlu1 %v2214_v3, %s2447_s1  ;;  %v440_v49 = vstv %s2656_s5  ;;  %p2405_p3 = scmp.ne.s32.totalorder %s1930_s25, %s2404_s26  ;;  %p2410_p5 = scmp.lt.s32.totalorder %s2404_s26, %s2404_s26 }
  0x72   :  { %vm459_vm3 = vcmp.eq.f32.partialorder %v2675_v57, 0.0 }
  0x73   :  { %2049 = vmatmul.mubr.msk.f32.vlgmr.msra.gmra.mrb[0].mxu0 %vm137_vm0, %v126_v11  ;;  %2230 = vrot.lane.b32.xlu0 %v2219_v10, %s2447_s1  ;;  %p2411_p6 = por %p2410_p5, %p2409_p4 }
  0x74   :  { %2070 = vmatprep.mubr.msk.f32.mxu0 %vm137_vm0, %v129_v31 }
  0x75   :  { %p2412_p7 = pnand %p2411_p6, %p2405_p3 }
  0x79   :  { %v2235_v43 = vpop.eup %2234 }
  0x7a   :  { %v2237_v44 = vpop.eup %2236  ;;  %v420_v45 = vmul.f32 0.6931472, %v2235_v43 }
  0x7b   :  { %v432_v46 = vmul.f32 0.6931472, %v2237_v44 }
  0x7c   :  { %2238 = vrcp.f32 %v420_v45 }
  0x7d   :  { %2240 = vrcp.f32 %v432_v46 }
  0x86   :  { %v2239_v47 = vpop.eup %2238 }
  0x87   :  { %v2241_v48 = vpop.eup %2240  ;;  %v441_v51 = vmul.f32 %v2239_v47, %v440_v49 }
  0x88   :  { %v445_v52 = vmul.f32 %v2241_v48, %v444_v50 }
  0x8a   :  { %v447_v55 = vadd.f32 %v445_v52, %v441_v51 }
  0x8c   :  { %v2679_v58 = vadd.f32 %v450_v56, %v447_v55  ;;  %v1983_v55 = vunpack.c.1.s8 %v2671_v53 }
  0xdd   :  { %v2216_v12 = vpop.permute.xlu0 %2215 }
  0xde   :  { %v2218_v13 = vunpack.i.h.bf16 %v2216_v12  ;;  %v2217_v14 = vunpack.i.l.bf16 %v2216_v12 }
  0xdf   :  { %v2634_v24 = vpop.permute.xlu1 %235 }
  0xe0   :  { %v2172_v15 = vpack.c.bf16 %v2218_v13, %v2217_v14 }
  0xe1   :  { %v2221_v16 = vpop.permute.xlu0 %2220 }
  0xe2   :  { %v2223_v17 = vunpack.i.h.bf16 %v2221_v16  ;;  %v2222_v18 = vunpack.i.l.bf16 %v2221_v16  ;;  %2173 = vmatprep.subr.bf16.mxu1 %v2172_v15 }
  0xe3   :  { %2175 = vmatpush3.bf16.msra.mxu1 %v2172_v15  ;;  %v2226_v29 = vpop.permute.xlu1 %2225 }
  0xe4   :  { %v2176_v19 = vpack.c.bf16 %v2223_v17, %v2222_v18  ;;  %v2228_v32 = vunpack.i.h.bf16 %v2226_v29  ;;  %v2227_v33 = vunpack.i.l.bf16 %v2226_v29  ;;  %v416_v29 = vld [vmem:[#allocation10 + $0x8] sm:$0xff] }
  0xe5   :  { %v2231_v30 = vpop.permute.xlu0 %2230  ;;  %v418_v31 = vadd.f32 2.7182817, %v416_v29 }
  0xe6   :  { %2177 = vmatprep.subr.bf16.mxu1 %v2176_v19  ;;  %v2233_v34 = vunpack.i.h.bf16 %v2231_v30  ;;  %v2232_v35 = vunpack.i.l.bf16 %v2231_v30  ;;  %v2180_v36 = vpack.c.bf16 %v2228_v32, %v2227_v33  ;;  %v428_v30 = vld [vmem:[#allocation12 + $0x8] sm:$0xff] }
  0xe7   :  { %2179 = vmatpush3.bf16.msra.mxu1 %v2176_v19  ;;  %v430_v32 = vadd.f32 2.7182817, %v428_v30 }
  0xe8   :  { %2073 = vmatprep.subr.mxu1 %v2445_v21  ;;  %v2184_v37 = vpack.c.bf16 %v2233_v34, %v2232_v35  ;;  %2181 = vmatprep.subr.bf16.mxu0 %v2180_v36 }
  0xe9   :  { %2183 = vmatpush3.bf16.msra.mxu0 %v2180_v36 }
  0xea   :  { %2060 = vmatmul.mubr.msk.f32.vlgmr.msra.gmra.mrb[0].mxu1 %vm137_vm0, %v128_v20  ;;  %2185 = vmatprep.subr.bf16.mxu0 %v2184_v37 }
  0xeb   :  { %2075 = vmatprep.mubr.msk.f32.mxu1 %vm2446_vm1, %v2445_v21 }
  0xed   :  { %2187 = vmatpush3.bf16.msra.mxu0 %v2184_v37 }
  0xee   :  { %2093 = vmatprep.subr.mxu0 %v2445_v21 }
  0xf0   :  { %2071 = vmatmul.mubr.msk.f32.vlgmr.msra.gmra.mrb[2].mxu0 %vm137_vm0, %v130_v38 }
  0xf1   :  { %2095 = vmatprep.mubr.msk.f32.mxu0 %vm2446_vm1, %v2445_v21 }
 0x146   :  { %v2630_v22 = vpop.f32.mrb[0].mxu0 }
 0x147   :  { %v210_v23 = vpop.f32.mrb[1].mxu0  ;;  %v216_v1 = vadd.f32 %v2630_v22, %v2618_v9 }
 0x148   :  { %v2642_v28 = vadd.f32 %v2618_v9, %v210_v23 }
 0x1bd   :  { %v2636_v25 = vpop.f32.mrb[0].mxu1 }
 0x1be   :  { %v310_v26 = vpop.f32.mrb[1].mxu1  ;;  %v316_v10 = vadd.f32 %v2636_v25, %v2634_v24 }
 0x1bf   :  { %v2639_v27 = vadd.f32 %v310_v26, %v2634_v24 }
 0x1c1   :  { %2074 = vmatpush3.xpose.msk.msra.mxu1 %vm460_vm2, %v2639_v27 }
 0x1c2   :  { %2078 = vmatprep.subr.mxu1 %v2445_v21 }
 0x1c3   :  { %v2072_v7 = vpop.f32.mrb[2].mxu0 }
 0x1c4   :  { %2076 = vmatmul.mubr.msk.f32.vlgmr.msra.gmra.mrb[2].mxu1 %vm460_vm2, %v2642_v28  ;;  %v406_v8 = vpop.f32.mrb[3].mxu0 }
 0x1c5   :  { %2080 = vmatprep.mubr.msk.f32.mxu1 %vm2446_vm1, %v2445_v21 }
 0x297   :  { %v533_v59 = vpop.f32.mrb[2].mxu1 }
 0x298   :  { %v537_v60 = vmul.f32 0.35355338, %v533_v59  ;;  %v2077_v61 = vpop.f32.mrb[3].mxu1 }
 0x29a   :  { %v538_v62 = vadd.f32 %v537_v60, %v2679_v58 }
 0x29c   :  { %v539_v63 = vsel %vm459_vm3, -1e+09, %v538_v62 }
 0x29d   :  { %v540_v0 = vsel %vm460_vm2, %v539_v63, -inf }
 0x29e   :  { %541 = vmax.xlane.f32.xlu1 %v540_v0 }
 0x2af   :  { %626 = vrot.lane.b32.xlu1 %v2639_v27, %s2448_s10 }
 0x2b3   :  { %624 = vrot.lane.b32.xlu1 %v2642_v28, %s2448_s10 }
 0x2b7   :  { %793 = vrot.lane.b32.xlu1 %v2642_v28, %s2449_s22 }
 0x2bb   :  { %961 = vrot.lane.b32.xlu1 %v2642_v28, %s2450_s23 }
 0x2bf   :  { %1310 = vrot.lane.b32.xlu1 %v216_v1, %s2448_s10 }
 0x2c3   :  { %1479 = vrot.lane.b32.xlu1 %v216_v1, %s2449_s22 }
 0x2c7   :  { %1647 = vrot.lane.b32.xlu1 %v216_v1, %s2450_s23 }
 0x32b   :  { %v542_v2 = vpop.xlane.xlu1 %541 }
 0x32c   :  { %v543_v3 = vsub.f32 %v539_v63, %v542_v2 }
 0x32e   :  { %v544_v4 = vmul.f32 1.442695, %v543_v3  ;;  %v458_v3 = vcvt.s32.f32 %v1983_v55 }
 0x32f   :  { %v627_v11 = vpop.permute.xlu1 %626 }
 0x330   :  { %2242 = vpow2.f32 %v544_v4  ;;  %vm1146_vm4 = vcmp.eq.f32.partialorder %v458_v3, 0.0 }
 0x333   :  { %v625_v13 = vpop.permute.xlu1 %624 }
 0x337   :  { %v794_v16 = vpop.permute.xlu1 %793 }
 0x33a   :  { %v2243_v5 = vpop.eup %2242 }
 0x33b   :  { %v546_v6 = vsel %vm460_vm2, %v2243_v5, 0.0  ;;  %v962_v22 = vpop.permute.xlu1 %961 }
 0x33c   :  { %547 = vadd.xlane.f32.xlu0 %v546_v6 }
 0x33f   :  { %v1311_v24 = vpop.permute.xlu1 %1310 }
 0x343   :  { %v1480_v26 = vpop.permute.xlu1 %1479 }
 0x347   :  { %v1648_v28 = vpop.permute.xlu1 %1647 }
 0x352   :  { %331 = vrot.lane.b32.xlu0 %v2618_v9, %s2447_s1 }
 0x356   :  { %795 = vrot.lane.b32.xlu0 %v2639_v27, %s2449_s22 }
 0x35a   :  { %963 = vrot.lane.b32.xlu0 %v2639_v27, %s2450_s23 }
 0x35e   :  { %1312 = vrot.lane.b32.xlu0 %v316_v10, %s2448_s10 }
 0x362   :  { %1481 = vrot.lane.b32.xlu0 %v316_v10, %s2449_s22 }
 0x366   :  { %1649 = vrot.lane.b32.xlu0 %v316_v10, %s2450_s23 }
 0x3c9   :  { %v548_v12 = vpop.xlane.xlu0 %547 }
 0x3ca   :  { %2244 = vrcp.f32 %v548_v12 }
 0x3cb   :  { %2246 = vlog2.f32 %v418_v31 }
 0x3cc   :  { %2248 = vlog2.f32 %v430_v32 }
 0x3cd   :  { %v332_v9 = vpop.permute.xlu0 %331 }
 0x3ce   :  { %v2711_v14 = vadd.f32 %v406_v8, %v332_v9  ;;  %v2713_v15 = vadd.f32 %v2072_v7, %v332_v9 }
 0x3d0   :  { %2079 = vmatpush3.msra.mxu1 %v2711_v14 }
 0x3d1   :  { %v796_v17 = vpop.permute.xlu0 %795  ;;  %2083 = vmatprep.subr.mxu1 %v2445_v21 }
 0x3d2   :  { %2094 = vmatpush3.xpose.msk.msra.mxu0 %vm460_vm2, %v796_v17 }
 0x3d3   :  { %2103 = vmatprep.subr.mxu0 %v2445_v21 }
 0x3d4   :  { %v2245_v18 = vpop.eup %2244 }
 0x3d5   :  { %v550_v19 = vmul.f32 %v2245_v18, %v2243_v5  ;;  %v964_v20 = vpop.permute.xlu0 %963  ;;  %2096 = vmatmul.mubr.msk.f32.vlgmr.msra.gmra.mrb[4].mxu0 %vm460_vm2, %v794_v16  ;;  %v2247_v33 = vpop.eup %2246 }
 0x3d6   :  { %2104 = vmatpush3.xpose.msk.msra.mxu0 %vm460_vm2, %v964_v20  ;;  %2105 = vmatprep.mubr.msk.f32.mxu0 %vm2446_vm1, %v2445_v21  ;;  %v2249_v34 = vpop.eup %2248  ;;  %v422_v35 = vmul.f32 0.6931472, %v2247_v33 }
 0x3d7   :  { %2081 = vmatmul.mubr.msk.f32.vlgmr.msra.gmra.mrb[4].mxu1 %vm460_vm2, %v550_v19  ;;  %2113 = vmatprep.subr.mxu0 %v2445_v21  ;;  %v434_v36 = vmul.f32 0.6931472, %v2249_v34 }
 0x3d8   :  { %2084 = vmatpush3.xpose.msk.msra.mxu1 %vm460_vm2, %v627_v11  ;;  %2085 = vmatprep.mubr.msk.f32.mxu1 %vm2446_vm1, %v2445_v21  ;;  %2250 = vrcp.f32 %v422_v35 }
 0x3d9   :  { %v1313_v23 = vpop.permute.xlu0 %1312  ;;  %2106 = vmatmul.mubr.msk.f32.vlgmr.msra.gmra.mrb[6].mxu0 %vm460_vm2, %v962_v22  ;;  %2088 = vmatprep.subr.mxu1 %v2445_v21  ;;  %2252 = vrcp.f32 %v434_v36 }
 0x3da   :  { %2114 = vmatpush3.xpose.msk.msra.mxu0 %vm460_vm2, %v316_v10  ;;  %2115 = vmatprep.mubr.msk.f32.mxu0 %vm2446_vm1, %v2445_v21 }
 0x3db   :  { %2086 = vmatmul.mubr.msk.f32.vlgmr.msra.gmra.mrb[6].mxu1 %vm460_vm2, %v625_v13  ;;  %2123 = vmatprep.subr.mxu0 %v2445_v21 }
 0x3dc   :  { %2090 = vmatprep.mubr.msk.f32.mxu1 %vm2446_vm1, %v2445_v21 }
 0x3dd   :  { %2116 = vmatmul.mubr.msk.f32.vlgmr.msra.gmra.mrb[8].mxu0 %vm460_vm2, %v216_v1  ;;  %v1482_v25 = vpop.permute.xlu0 %1481 }
 0x3de   :  { %2124 = vmatpush3.xpose.msk.msra.mxu0 %vm460_vm2, %v1313_v23  ;;  %2125 = vmatprep.mubr.msk.f32.mxu0 %vm2446_vm1, %v2445_v21 }
 0x3df   :  { %2133 = vmatprep.subr.mxu0 %v2445_v21 }
 0x3e1   :  { %2126 = vmatmul.mubr.msk.f32.vlgmr.msra.gmra.mrb[10].mxu0 %vm460_vm2, %v1311_v24  ;;  %v1650_v27 = vpop.permute.xlu0 %1649 }
 0x3e2   :  { %2134 = vmatpush3.xpose.msk.msra.mxu0 %vm460_vm2, %v1482_v25  ;;  %2135 = vmatprep.mubr.msk.f32.mxu0 %vm2446_vm1, %v2445_v21  ;;  %v2251_v37 = vpop.eup %2250 }
 0x3e3   :  { %2143 = vmatprep.subr.mxu0 %v2445_v21  ;;  %v2253_v38 = vpop.eup %2252  ;;  %v442_v40 = vmul.f32 %v2251_v37, %v440_v49 }
 0x3e4   :  { %v446_v41 = vmul.f32 %v2253_v38, %v444_v50 }
 0x3e5   :  { %2136 = vmatmul.mubr.msk.f32.vlgmr.msra.gmra.mrb[12].mxu0 %vm460_vm2, %v1480_v26 }
 0x3e6   :  { %2144 = vmatpush3.xpose.msk.msra.mxu0 %vm460_vm2, %v1650_v27  ;;  %2145 = vmatprep.mubr.msk.f32.mxu0 %vm2446_vm1, %v2445_v21  ;;  %v448_v48 = vadd.f32 %v446_v41, %v442_v40 }
 0x3e8   :  { %v452_v61 = vadd.f32 %v450_v56, %v448_v48 }
 0x3e9   :  { %2146 = vmatmul.mubr.msk.f32.vlgmr.msra.gmra.mrb[14].mxu0 %vm460_vm2, %v1648_v28 }
 0x4a8   :  { %v867_v39 = vpop.f32.mrb[4].mxu0 }
 0x4a9   :  { %v871_v42 = vmul.f32 0.35355338, %v867_v39  ;;  %v2097_v43 = vpop.f32.mrb[5].mxu0 }
 0x4aa   :  { %v2756_v44 = vpop.f32.mrb[4].mxu1 }
 0x4ab   :  { %v872_v45 = vadd.f32 %v871_v42, %v2679_v58  ;;  %v2082_v46 = vpop.f32.mrb[5].mxu1 }
 0x4ac   :  { %v1035_v47 = vpop.f32.mrb[6].mxu0 }
 0x4ad   :  { %v1039_v51 = vmul.f32 0.35355338, %v1035_v47  ;;  %v2107_v52 = vpop.f32.mrb[7].mxu0  ;;  %v873_v54 = vsel %vm459_vm3, -1e+09, %v872_v45 }
 0x4ae   :  { %v698_v49 = vpop.f32.mrb[6].mxu1  ;;  %v874_v50 = vsel %vm460_vm2, %v873_v54, -inf }
 0x4af   :  { %v702_v59 = vmul.f32 0.35355338, %v698_v49  ;;  %875 = vmax.xlane.f32.xlu1 %v874_v50  ;;  %v2087_v60 = vpop.f32.mrb[7].mxu1  ;;  %v1040_v63 = vadd.f32 %v1039_v51, %v2679_v58 }
 0x4b0   :  { %v1219_v62 = vpop.f32.mrb[8].mxu0 }
 0x4b1   :  { %v703_v0 = vadd.f32 %v702_v59, %v2679_v58  ;;  %v1223_v1 = vmul.f32 0.35355338, %v1219_v62  ;;  %v2117_v2 = vpop.f32.mrb[9].mxu0  ;;  %v1041_v56 = vsel %vm459_vm3, -1e+09, %v1040_v63 }
 0x4b2   :  { %v1042_v58 = vsel %vm460_vm2, %v1041_v56, -inf }
 0x4b3   :  { %v704_v4 = vsel %vm459_vm3, -1e+09, %v703_v0  ;;  %v1224_v53 = vadd.f32 %v1223_v1, %v452_v61 }
 0x4b4   :  { %v1384_v5 = vpop.f32.mrb[10].mxu0  ;;  %v705_v6 = vsel %vm460_vm2, %v704_v4, -inf }
 0x4b5   :  { %v1388_v7 = vmul.f32 0.35355338, %v1384_v5  ;;  %v2127_v8 = vpop.f32.mrb[11].mxu0  ;;  %706 = vmax.xlane.f32.xlu0 %v705_v6  ;;  %v1225_v12 = vsel %vm1146_vm4, -1e+09, %v1224_v53 }
 0x4b6   :  { %v1226_v57 = vsel %vm460_vm2, %v1225_v12, -inf }
 0x4b7   :  { %v1389_v10 = vadd.f32 %v1388_v7, %v452_v61 }
 0x4b8   :  { %v1553_v11 = vpop.f32.mrb[12].mxu0 }
 0x4b9   :  { %v1557_v13 = vmul.f32 0.35355338, %v1553_v11  ;;  %v2137_v9 = vpop.f32.mrb[13].mxu0  ;;  %1043 = vmax.xlane.f32.xlu0 %v1042_v58  ;;  %v1390_v16 = vsel %vm1146_vm4, -1e+09, %v1389_v10 }
 0x4ba   :  { %v1391_v17 = vsel %vm460_vm2, %v1390_v16, -inf }
 0x4bb   :  { %v1558_v18 = vadd.f32 %v1557_v13, %v452_v61  ;;  %1392 = vmax.xlane.f32.xlu1 %v1391_v17 }
 0x4bc   :  { %v1721_v19 = vpop.f32.mrb[14].mxu0 }
 0x4bd   :  { %v1725_v20 = vmul.f32 0.35355338, %v1721_v19  ;;  %v2147_v22 = vpop.f32.mrb[15].mxu0  ;;  %1227 = vmax.xlane.f32.xlu0 %v1226_v57  ;;  %v1559_v23 = vsel %vm1146_vm4, -1e+09, %v1558_v18 }
 0x4be   :  { %v1560_v25 = vsel %vm460_vm2, %v1559_v23, -inf }
 0x4bf   :  { %v1726_v24 = vadd.f32 %v1725_v20, %v452_v61 }
 0x4c1   :  { %1561 = vmax.xlane.f32.xlu0 %v1560_v25  ;;  %v1727_v26 = vsel %vm1146_vm4, -1e+09, %v1726_v24 }
 0x4c2   :  { %v1728_v27 = vsel %vm460_vm2, %v1727_v26, -inf }
 0x4c3   :  { %1729 = vmax.xlane.f32.xlu1 %v1728_v27 }
 0x53c   :  { %v876_v28 = vpop.xlane.xlu1 %875 }
 0x53d   :  { %v877_v29 = vsub.f32 %v873_v54, %v876_v28 }
 0x53f   :  { %v878_v30 = vmul.f32 1.442695, %v877_v29 }
 0x541   :  { %2254 = vpow2.f32 %v878_v30  ;;  %v1830_v30 = vld [vmem:[#allocation9] sm:$0xff] }
 0x542   :  { %v707_v31 = vpop.xlane.xlu0 %706 }
 0x543   :  { %v708_v45 = vsub.f32 %v704_v4, %v707_v31  ;;  %v1831_v31 = vld [vmem:[#allocation9 + $0x8] sm:$0xff] }
 0x545   :  { %v709_v52 = vmul.f32 1.442695, %v708_v45 }
 0x546   :  { %v1044_v32 = vpop.xlane.xlu0 %1043 }
 0x547   :  { %v1045_v33 = vsub.f32 %v1041_v56, %v1044_v32 }
 0x548   :  { %v1393_v34 = vpop.xlane.xlu1 %1392 }
 0x549   :  { %v1046_v35 = vmul.f32 1.442695, %v1045_v33  ;;  %v1394_v36 = vsub.f32 %v1390_v16, %v1393_v34  ;;  %v2188_v33 = vpack.c.bf16 %v1831_v31, %v1830_v30 }
 0x54a   :  { %v1228_v37 = vpop.xlane.xlu0 %1227 }
 0x54b   :  { %v2781_v38 = vpop.eup %2254  ;;  %2256 = vpow2.f32 %v1046_v35  ;;  %v1395_v39 = vmul.f32 1.442695, %v1394_v36  ;;  %v1229_v40 = vsub.f32 %v1225_v12, %v1228_v37  ;;  %2189 = vmatprep.subr.bf16.mxu0 %v2188_v33  ;;  %v1832_v35 = vld [vmem:[#allocation9 + $0x10] sm:$0xff]  ;;  %v1833_v36 = vld [vmem:[#allocation9 + $0x18] sm:$0xff] }
 0x54c   :  { %v880_v41 = vsel %vm460_vm2, %v2781_v38, 0.0  ;;  %2191 = vmatpush3.bf16.msra.mxu0 %v2188_v33  ;;  %v2192_v37 = vpack.c.bf16 %v1833_v36, %v1832_v35 }
 0x54d   :  { %2258 = vpow2.f32 %v1395_v39  ;;  %v1230_v42 = vmul.f32 1.442695, %v1229_v40  ;;  %881 = vadd.xlane.f32.xlu1 %v880_v41 }
 0x54e   :  { %v1562_v43 = vpop.xlane.xlu0 %1561  ;;  %2193 = vmatprep.subr.bf16.mxu0 %v2192_v37 }
 0x54f   :  { %2260 = vpow2.f32 %v1230_v42  ;;  %v1563_v46 = vsub.f32 %v1559_v23, %v1562_v43 }
 0x550   :  { %v1730_v47 = vpop.xlane.xlu1 %1729  ;;  %2195 = vmatpush3.bf16.msra.mxu0 %v2192_v37 }
 0x551   :  { %v1564_v48 = vmul.f32 1.442695, %v1563_v46  ;;  %v1731_v51 = vsub.f32 %v1727_v26, %v1730_v47 }
 0x553   :  { %2262 = vpow2.f32 %v1564_v48  ;;  %v1732_v54 = vmul.f32 1.442695, %v1731_v51 }
 0x555   :  { %v2257_v55 = vpop.eup %2256  ;;  %2264 = vpow2.f32 %v1732_v54 }
 0x556   :  { %v1048_v49 = vsel %vm460_vm2, %v2257_v55, 0.0  ;;  %2266 = vpow2.f32 %v709_v52 }
 0x557   :  { %v2786_v50 = vpop.eup %2258  ;;  %1049 = vadd.xlane.f32.xlu0 %v1048_v49 }
 0x558   :  { %v1397_v60 = vsel %vm460_vm2, %v2786_v50, 0.0 }
 0x559   :  { %v2261_v59 = vpop.eup %2260 }
 0x55a   :  { %v1232_v61 = vsel %vm460_vm2, %v2261_v59, 0.0 }
 0x55b   :  { %1398 = vadd.xlane.f32.xlu0 %v1397_v60  ;;  %1233 = vadd.xlane.f32.xlu1 %v1232_v61 }
 0x55d   :  { %v2791_v62 = vpop.eup %2262 }
 0x55e   :  { %v1566_v63 = vsel %vm460_vm2, %v2791_v62, 0.0 }
 0x55f   :  { %v2795_v0 = vpop.eup %2264  ;;  %1567 = vadd.xlane.f32.xlu1 %v1566_v63 }
 0x560   :  { %v1734_v1 = vsel %vm460_vm2, %v2795_v0, 0.0  ;;  %v2267_v2 = vpop.eup %2266 }
 0x561   :  { %1735 = vadd.xlane.f32.xlu0 %v1734_v1  ;;  %v711_v3 = vsel %vm460_vm2, %v2267_v2, 0.0 }
 0x565   :  { %712 = vadd.xlane.f32.xlu0 %v711_v3 }
 0x570   :  { %717 = vrot.lane.b32.xlu1 %v2711_v14, %s2448_s10 }
 0x574   :  { %1053 = vrot.lane.b32.xlu1 %v2711_v14, %s2450_s23 }
 0x578   :  { %1403 = vrot.lane.b32.xlu1 %v2713_v15, %s2448_s10 }
 0x57b   :  { %885 = vrot.lane.b32.xlu0 %v2711_v14, %s2449_s22 }
 0x57c   :  { %1739 = vrot.lane.b32.xlu1 %v2713_v15, %s2450_s23 }
 0x57f   :  { %1571 = vrot.lane.b32.xlu0 %v2713_v15, %s2449_s22 }
 0x5da   :  { %v882_v4 = vpop.xlane.xlu1 %881 }
 0x5e4   :  { %v1050_v53 = vpop.xlane.xlu0 %1049 }
 0x5e8   :  { %v1234_v5 = vpop.xlane.xlu1 %1233  ;;  %v1399_v6 = vpop.xlane.xlu0 %1398 }
 0x5ec   :  { %v1568_v7 = vpop.xlane.xlu1 %1567 }
 0x5ee   :  { %v1736_v8 = vpop.xlane.xlu0 %1735 }
 0x5f0   :  { %v718_v56 = vpop.permute.xlu1 %717 }
 0x5f1   :  { %2089 = vmatpush3.msra.mxu1 %v718_v56 }
 0x5f2   :  { %v713_v10 = vpop.xlane.xlu0 %712  ;;  %2098 = vmatprep.subr.mxu1 %v2445_v21 }
 0x5f3   :  { %2268 = vrcp.f32 %v713_v10 }
 0x5f4   :  { %2270 = vrcp.f32 %v882_v4  ;;  %v1054_v16 = vpop.permute.xlu1 %1053 }
 0x5f5   :  { %2272 = vrcp.f32 %v1050_v53 }
 0x5f6   :  { %2274 = vrcp.f32 %v1234_v5  ;;  %v886_v12 = vpop.permute.xlu0 %885 }
 0x5f7   :  { %2276 = vrcp.f32 %v1399_v6 }
 0x5f8   :  { %2278 = vrcp.f32 %v1568_v7  ;;  %v1404_v20 = vpop.permute.xlu1 %1403 }
 0x5f9   :  { %2280 = vrcp.f32 %v1736_v8 }
 0x5fc   :  { %v1740_v26 = vpop.permute.xlu1 %1739 }
 0x5fd   :  { %v2269_v14 = vpop.eup %2268 }
 0x5fe   :  { %v715_v11 = vmul.f32 %v2269_v14, %v2267_v2  ;;  %v2271_v58 = vpop.eup %2270 }
 0x5ff   :  { %v884_v13 = vmul.f32 %v2271_v58, %v2781_v38  ;;  %v2273_v9 = vpop.eup %2272 }
 0x600   :  { %2091 = vmatmul.mubr.msk.f32.vlgmr.msra.gmra.mrb[8].mxu1 %vm460_vm2, %v715_v11  ;;  %v1052_v17 = vmul.f32 %v2273_v9, %v2257_v55  ;;  %v2275_v18 = vpop.eup %2274 }
 0x601   :  { %2099 = vmatpush3.msra.mxu1 %v886_v12  ;;  %2100 = vmatprep.mubr.msk.f32.mxu1 %vm2446_vm1, %v2445_v21  ;;  %v1236_v19 = vmul.f32 %v2275_v18, %v2261_v59  ;;  %v2277_v57 = vpop.eup %2276 }
 0x602   :  { %2108 = vmatprep.subr.mxu1 %v2445_v21  ;;  %v1401_v22 = vmul.f32 %v2277_v57, %v2786_v50  ;;  %v2279_v23 = vpop.eup %2278 }
 0x603   :  { %v1570_v24 = vmul.f32 %v2279_v23, %v2791_v62  ;;  %v2281_v25 = vpop.eup %2280 }
 0x604   :  { %2101 = vmatmul.mubr.msk.f32.vlgmr.msra.gmra.mrb[10].mxu1 %vm460_vm2, %v884_v13  ;;  %v1738_v27 = vmul.f32 %v2281_v25, %v2795_v0  ;;  %v1977_v0 = vld [vmem:[%s2876_s7] ss:$0 sm:$0xff] }
 0x605   :  { %2109 = vmatpush3.msra.mxu1 %v1054_v16  ;;  %2110 = vmatprep.mubr.msk.f32.mxu1 %vm2446_vm1, %v2445_v21 }
 0x606   :  { %2118 = vmatprep.subr.mxu1 %v2445_v21 }
 0x608   :  { %2111 = vmatmul.mubr.msk.f32.vlgmr.msra.gmra.mrb[12].mxu1 %vm460_vm2, %v1052_v17 }
 0x609   :  { %2119 = vmatpush3.msra.mxu1 %v2713_v15  ;;  %2120 = vmatprep.mubr.msk.f32.mxu1 %vm2446_vm1, %v2445_v21  ;;  %v1572_v15 = vpop.permute.xlu0 %1571 }
 0x60a   :  { %2128 = vmatprep.subr.mxu1 %v2445_v21 }
 0x60c   :  { %2121 = vmatmul.mubr.msk.f32.vlgmr.msra.gmra.mrb[14].mxu1 %vm460_vm2, %v1236_v19 }
 0x60d   :  { %2129 = vmatpush3.msra.mxu1 %v1404_v20  ;;  %2130 = vmatprep.mubr.msk.f32.mxu1 %vm2446_vm1, %v2445_v21 }
 0x60e   :  { %2138 = vmatprep.subr.mxu1 %v2445_v21 }
 0x610   :  { %2131 = vmatmul.mubr.msk.f32.vlgmr.msra.gmra.mrb[16].mxu1 %vm460_vm2, %v1401_v22 }
 0x611   :  { %2139 = vmatpush3.msra.mxu1 %v1572_v15  ;;  %2140 = vmatprep.mubr.msk.f32.mxu1 %vm2446_vm1, %v2445_v21 }
 0x612   :  { %2148 = vmatprep.subr.mxu1 %v2445_v21 }
 0x614   :  { %2141 = vmatmul.mubr.msk.f32.vlgmr.msra.gmra.mrb[18].mxu1 %vm460_vm2, %v1570_v24 }
 0x615   :  { %2149 = vmatpush3.msra.mxu1 %v1740_v26  ;;  %2150 = vmatprep.mubr.msk.f32.mxu1 %vm2446_vm1, %v2445_v21 }
 0x618   :  { %2151 = vmatmul.mubr.msk.f32.vlgmr.msra.gmra.mrb[20].mxu1 %vm460_vm2, %v1738_v27 }
 0x6d3   :  { %v789_v28 = vpop.f32.mrb[8].mxu1 }
 0x6d4   :  { %1130 = vrot.lane.b32.xlu0 %v789_v28, %s2439_s30  ;;  %v2092_v29 = vpop.f32.mrb[9].mxu1 }
 0x6d7   :  { %v957_v32 = vpop.f32.mrb[10].mxu1 }
 0x6d8   :  { %1134 = vrot.lane.b32.xlu1 %v957_v32, %s2451_s3  ;;  %v2102_v34 = vpop.f32.mrb[11].mxu1 }
 0x6db   :  { %v1125_v21 = vpop.f32.mrb[12].mxu1 }
 0x6dc   :  { %1138 = vrot.lane.b32.xlu1 %v1125_v21, %s2452_s6  ;;  %v2112_v38 = vpop.f32.mrb[13].mxu1 }
 0x6df   :  { %v1306_v39 = vpop.f32.mrb[14].mxu1 }
 0x6e0   :  { %v2122_v40 = vpop.f32.mrb[15].mxu1 }
 0x6e3   :  { %v1475_v41 = vpop.f32.mrb[16].mxu1 }
 0x6e4   :  { %1816 = vrot.lane.b32.xlu0 %v1475_v41, %s2439_s30  ;;  %v2132_v42 = vpop.f32.mrb[17].mxu1 }
 0x6e7   :  { %v1643_v43 = vpop.f32.mrb[18].mxu1 }
 0x6e8   :  { %1820 = vrot.lane.b32.xlu0 %v1643_v43, %s2451_s3  ;;  %v2142_v45 = vpop.f32.mrb[19].mxu1 }
 0x6eb   :  { %v1811_v46 = vpop.f32.mrb[20].mxu1 }
 0x6ec   :  { %1824 = vrot.lane.b32.xlu1 %v1811_v46, %s2452_s6  ;;  %v2152_v47 = vpop.f32.mrb[21].mxu1 }
 0x746   :  { %v1131_v48 = vpop.permute.xlu0 %1130 }
 0x747   :  { %v1141_v52 = vsel %vm460_vm2, %v2756_v44, %v1131_v48 }
 0x74a   :  { %v1135_v51 = vpop.permute.xlu1 %1134 }
 0x74b   :  { %v1143_v54 = vsel %vm1142_vm5, %v1141_v52, %v1135_v51 }
 0x74e   :  { %v1139_v55 = vpop.permute.xlu1 %1138 }
 0x74f   :  { %v1145_v49 = vsel %vm1144_vm6, %v1143_v54, %v1139_v55 }
 0x750   :  { %2161 = vmatprep.mubr.msk.f32.mxu0 %vm137_vm0, %v1145_v49 }
 0x756   :  { %v1817_v50 = vpop.permute.xlu0 %1816 }
 0x757   :  { %v1827_v60 = vsel %vm460_vm2, %v1306_v39, %v1817_v50 }
 0x75a   :  { %v1821_v59 = vpop.permute.xlu0 %1820 }
 0x75b   :  { %v1828_v61 = vsel %vm1142_vm5, %v1827_v60, %v1821_v59 }
 0x75e   :  { %v1825_v62 = vpop.permute.xlu1 %1824 }
 0x75f   :  { %v1829_v63 = vsel %vm1144_vm6, %v1828_v61, %v1825_v62 }
 0x760   :  { %2162 = vmatmul.mubr.msk.f32.vlgmr.msra.gmra.mrb[16].mxu0 %vm137_vm0, %v1829_v63 }
 0x833   :  { %v2163_v44 = vpop.f32.mrb[16].mxu0 }
 0x834   :  { %v1919_v1 = vadd.f32 %v2163_v44, %v1977_v0  ;;  %v1913_v2 = vpop.f32.mrb[17].mxu0 }
 0x835   :  { %v1914_v3 = vadd.f32 %v1977_v0, %v1913_v2 }
 0x836   :  { %1923 = vst.msk [vmem:[#allocation13 + $0x8] sm:$0xff] %vm137_vm0, %v1919_v1 }
 0x837   :  { %1922 = vst.msk [vmem:[#allocation13] sm:$0xff] %vm137_vm0, %v1914_v3 }
 0x838   :  { %2415 = shalt.err (!%p2412_p7)
}
 0x839   :  { %s2416_s28 = scalar_lea.hbm %s2880_s11, 256 }
 0x83a   :  { %p2417_p8 = scmp.ne.s32.totalorder %s2880_s11, %s2416_s28  ;;  %p2420_p9 = scmp.lt.u32.totalorder %s2416_s28, %s2880_s11 }
 0x83c   :  { %p2422_p10 = pnand %p2420_p9, %p2417_p8 }
 0x83e   :  { %2425 = shalt.err (!%p2422_p10)
}
 0x83f   :  { %1935 = dma.vmem_to_hbm [thread:$0]  %s1930_s25, 256, %s2880_s11, [#allocation4], %s2438_s29, %s2438_s29, %s2439_s30  }
 0x840   :  { %2434 = dma.done.wait [#allocation4], 256  }
 0x841   :  { %2435 = vsyncadd [#allocation4], 4294967040 }
 0x842   :  { %1939 = vsyncpa [#allocation3], 1 }
 0x843   :  { %1940 = vsyncpa [#allocation8], 1 }
 0x844   :  { %1941 = vsyncpa [#allocation11], 1 }
 0x845   :  { %1942 = vsyncpa [#allocation4], 1 }
 0x846   :  { %1943 = vsyncpa [#allocation5], 1 }

</bundles_post_ra>
